<compile_context>
chip_gen: v7x
topology: tpu7x:2x2x1
jax: 0.10.0
libtpu: 0.0.40
codegen_flags: <defaults>
</compile_context>

<pallas_src>
import jax
import jax.numpy as jnp
from jax import lax
from jax.experimental import pallas as pl

# Small, forward-consistent sizes.
BATCH = 2
SEQ = 8
HIDDEN = 32
HEADS = 4
D_K = HIDDEN // HEADS
D_FF = 4 * HIDDEN
EPS = 1e-6
NEG_INF = -1e9


def _layer_norm(x, gamma, beta):
    mean = jnp.mean(x, axis=-1, keepdims=True)
    var = jnp.mean(jnp.square(x - mean), axis=-1, keepdims=True)
    return (x - mean) * lax.rsqrt(var + EPS) * gamma + beta


# ---------------------------------------------------------------------------
# Fused kernel (single grid step): LN1 + MHA + residual, then LN2 + FFN +
# residual, over all B*T rows at once.
# ---------------------------------------------------------------------------
def transformer_block_kernel(x_ref, pose_ref, mask_ref, oscore_ref,
                             wqkv_ref, wo_ref, w1_ref, w2_ref,
                             bias_ref, ln_ref,
                             out_ref, scores_ref):
    x = x_ref[...]               # (B*T, C) f32
    pose = pose_ref[...]         # (B*T, C) f32
    mask = mask_ref[...]         # (B, 1, T, T) f32 (0/1)
    osc = oscore_ref[...]        # (B, H, T, T) f32
    wo = wo_ref[...]             # (C, C) bf16
    b_all = bias_ref[...]        # (4, D_FF) f32  packed biases
    ln = ln_ref[...]             # (4, C)    f32  packed LN params

    bqkv = b_all[0:1, :3 * HIDDEN]
    bo = b_all[1:2, :HIDDEN]
    b1 = b_all[2:3, :]
    b2 = b_all[3:4, :HIDDEN]
    ln1_g, ln1_b = ln[0:1, :], ln[1:2, :]
    ln2_g, ln2_b = ln[2:3, :], ln[3:4, :]

    # ---------------- input sublayer: LN -> (+pose) -> MHA -> residual ------
    h = _layer_norm(x, ln1_g, ln1_b) + pose

    # Packed QKV projection: one (B*T, C) @ (C, 3C) bf16 MXU matmul, f32 acc.
    # NOTE: activations stay bf16 for the MXU; on v5e (no bf16 VALU) these
    # casts could be gated off per-generation.
    qkv = jnp.dot(h.astype(jnp.bfloat16), wqkv_ref[...],
                  preferred_element_type=jnp.float32) + bqkv     # (B*T, 3C)

    scale = 1.0 / (D_K ** 0.5)
    contract_last = (((1,), (1,)), ((), ()))   # q @ k^T without explicit .T

    attn_rows = []
    all_p = []
    for b in range(BATCH):                     # static, fully unrolled
        row0 = b * SEQ
        qkv_b = qkv[row0:row0 + SEQ, :]        # (T, 3C)
        masked = mask[b, 0] == 0.0             # (T, T) bool
        acc = jnp.zeros((SEQ, HIDDEN), jnp.float32)
        for hh in range(HEADS):                # static, fully unrolled
            c0 = hh * D_K
            q_bh = qkv_b[:, c0:c0 + D_K]                              # (T, Dk)
            k_bh = qkv_b[:, HIDDEN + c0:HIDDEN + c0 + D_K]            # (T, Dk)
            v_bh = qkv_b[:, 2 * HIDDEN + c0:2 * HIDDEN + c0 + D_K]    # (T, Dk)

            logits = lax.dot_general(
                q_bh, k_bh, contract_last,
                preferred_element_type=jnp.float32) * scale           # (T, T)
            logits = logits + osc[b, hh]
            logits = jnp.where(masked, NEG_INF, logits)

            # Explicit softmax (exact divide so probability rows sum to 1).
            m = jnp.max(logits, axis=-1, keepdims=True)
            e = jnp.exp(logits - m)
            s = jnp.sum(e, axis=-1, keepdims=True)
            p = e / s                                                  # (T, T)
            all_p.append(p)

            # Per-head context + per-head slice of the output projection:
            # sum_h ctx_h @ Wo[h*Dk:(h+1)*Dk, :]  ==  concat_h(ctx_h) @ Wo,
            # but without any lane-concat of the per-head context blocks.
            ctx = jnp.dot(p, v_bh, preferred_element_type=jnp.float32)  # (T,Dk)
            acc = acc + jnp.dot(ctx.astype(jnp.bfloat16),
                                wo[c0:c0 + D_K, :],
                                preferred_element_type=jnp.float32)     # (T, C)
        attn_rows.append(acc)

    # Single scores store; the leading-dim stack/reshape touches no lane data.
    scores_ref[...] = jnp.stack(all_p).reshape(
        BATCH, HEADS, SEQ, SEQ).astype(scores_ref.dtype)

    attn = jnp.concatenate(attn_rows, axis=0) + bo   # (B*T, C)
    x1 = x + attn                                    # residual (dropout p = 0)

    # ---------------- output sublayer: LN -> FFN(gelu) -> residual ----------
    h2 = _layer_norm(x1, ln2_g, ln2_b)
    hid = jax.nn.gelu(
        jnp.dot(h2.astype(jnp.bfloat16), w1_ref[...],
                preferred_element_type=jnp.float32) + b1)        # (B*T, D_FF)
    ff = jnp.dot(hid.astype(jnp.bfloat16), w2_ref[...],
                 preferred_element_type=jnp.float32) + b2        # (B*T, C)
    out_ref[...] = (x1 + ff).astype(out_ref.dtype)   # residual (dropout p = 0)


# ---------------------------------------------------------------------------
# Wrapper
# ---------------------------------------------------------------------------
def _full_spec(shape):
    n = len(shape)
    return pl.BlockSpec(shape, lambda i, _n=n: (0,) * _n)


def transformer_block(x, mask, other_score, pose, params):
    B, T, C = x.shape
    x2 = x.reshape(B * T, C)
    pose2 = pose.reshape(B * T, C)

    call = pl.pallas_call(
        transformer_block_kernel,
        out_shape=(jax.ShapeDtypeStruct((B * T, C), jnp.float32),
                   jax.ShapeDtypeStruct((B, HEADS, T, T), jnp.float32)),
        grid=(1,),                       # single step: one prologue, M = B*T
        in_specs=[
            _full_spec((B * T, C)),            # x (flattened rows)
            _full_spec((B * T, C)),            # pose
            _full_spec((B, 1, T, T)),          # mask
            _full_spec((B, HEADS, T, T)),      # other_score
            _full_spec((C, 3 * C)),            # Wqkv (bf16)
            _full_spec((C, C)),                # Wo   (bf16)
            _full_spec((C, D_FF)),             # W1   (bf16)
            _full_spec((D_FF, C)),             # W2   (bf16)
            _full_spec((4, D_FF)),             # packed biases
            _full_spec((4, C)),                # packed LN gamma/beta
        ],
        out_specs=(_full_spec((B * T, C)),
                   _full_spec((B, HEADS, T, T))),
        # The flattened x slab is fully overwritten by the residual output.
        input_output_aliases={0: 0},
    )

    out2, scores = call(
        x2, pose2, mask, other_score,
        params["wqkv"], params["wo"], params["w1"], params["w2"],
        params["biases"], params["ln"])

    # Final nn.Dropout with p = 0 -> identity.
    return out2.reshape(B, T, C), scores


def init_params(key):
    """Deterministic parameter init.

    Linear weights are pre-transposed to (in, out) and stored in bf16 (MXU
    native on v6e/v7x); biases / norm params are packed f32 slabs.
    """
    def lin_w(k, fan_in, fan_out):
        return (jax.random.normal(k, (fan_in, fan_out), jnp.float32) * 0.02
                ).astype(jnp.bfloat16)

    def lin_b(k, fan_out):
        return jax.random.normal(k, (fan_out,), jnp.float32) * 0.02

    ks = jax.random.split(key, 8)
    wqkv = lin_w(ks[0], HIDDEN, 3 * HIDDEN)   # packed Q,K,V
    wo = lin_w(ks[1], HIDDEN, HIDDEN)
    w1 = lin_w(ks[2], HIDDEN, D_FF)
    w2 = lin_w(ks[3], D_FF, HIDDEN)
    bqkv = lin_b(ks[4], 3 * HIDDEN)
    bo = lin_b(ks[5], HIDDEN)
    b1 = lin_b(ks[6], D_FF)
    b2 = lin_b(ks[7], HIDDEN)

    # Pack the four biases into one (4, D_FF) slab (rows sliced in-kernel).
    biases = jnp.zeros((4, D_FF), jnp.float32)
    biases = biases.at[0, :3 * HIDDEN].set(bqkv)
    biases = biases.at[1, :HIDDEN].set(bo)
    biases = biases.at[2, :].set(b1)
    biases = biases.at[3, :HIDDEN].set(b2)

    # Pack LN params: rows = [ln1_gamma, ln1_beta, ln2_gamma, ln2_beta].
    ln = jnp.concatenate([jnp.ones((1, HIDDEN), jnp.float32),
                          jnp.zeros((1, HIDDEN), jnp.float32),
                          jnp.ones((1, HIDDEN), jnp.float32),
                          jnp.zeros((1, HIDDEN), jnp.float32)], axis=0)

    return {"wqkv": wqkv, "wo": wo, "w1": w1, "w2": w2,
            "biases": biases, "ln": ln}


if __name__ == "__main__":
    root = jax.random.PRNGKey(0)
    k_param, k_x, k_pose, k_os = jax.random.split(root, 4)

    params = init_params(k_param)

    x = jax.random.normal(k_x, (BATCH, SEQ, HIDDEN), jnp.float32)
    pose = jax.random.normal(k_pose, (BATCH, SEQ, HIDDEN), jnp.float32) * 0.1
    other_score = jax.random.normal(
        k_os, (BATCH, HEADS, SEQ, SEQ), jnp.float32) * 0.1

    # Padding-style mask: batch 1 has its last 2 key positions masked out.
    mask = jnp.ones((BATCH, 1, SEQ, SEQ), jnp.float32)
    mask = mask.at[1, 0, :, SEQ - 2:].set(0.0)

    out, scores = transformer_block(x, mask, other_score, pose, params)
    jax.block_until_ready((out, scores))

    assert out.shape == (BATCH, SEQ, HIDDEN)
    assert scores.shape == (BATCH, HEADS, SEQ, SEQ)
    assert bool(jnp.all(jnp.isfinite(out)))
    assert bool(jnp.all(jnp.isfinite(scores)))
    # Softmax rows sum to 1 (exact divide) and masked keys get ~0 probability.
    assert bool(jnp.allclose(scores.sum(-1), 1.0, atol=1e-4))
    assert bool(jnp.all(scores[1, :, :, SEQ - 2:] < 1e-6))
    print("KERNEL_OK")
</pallas_src>

<mosaic_0001>
module attributes {stable_mosaic.version = 11 : i64} {
  func.func @transformer_block_kernel(%arg0: i32, %arg1: memref<16x32xf32, #tpu.memory_space<vmem>>, %arg2: memref<16x32xf32, #tpu.memory_space<vmem>>, %arg3: memref<2x1x8x8xf32, #tpu.memory_space<vmem>>, %arg4: memref<2x4x8x8xf32, #tpu.memory_space<vmem>>, %arg5: memref<32x96xbf16, #tpu.memory_space<vmem>>, %arg6: memref<32x32xbf16, #tpu.memory_space<vmem>>, %arg7: memref<32x128xbf16, #tpu.memory_space<vmem>>, %arg8: memref<128x32xbf16, #tpu.memory_space<vmem>>, %arg9: memref<4x128xf32, #tpu.memory_space<vmem>>, %arg10: memref<4x32xf32, #tpu.memory_space<vmem>>, %arg11: memref<16x32xf32, #tpu.memory_space<vmem>>, %arg12: memref<2x4x8x8xf32, #tpu.memory_space<vmem>>) attributes {dimension_semantics = [#tpu.dimension_semantics<arbitrary>], iteration_bounds = array<i64: 1>, scalar_prefetch = 0 : i64, scratch_operands = 0 : i64, tpu.core_type = #tpu.core_type<tc>, window_params = [{pipeline_mode = #tpu.pipeline_mode<synchronous>, transform_indices = @transform_0, window_bounds = array<i64: 16, 32>}, {pipeline_mode = #tpu.pipeline_mode<synchronous>, transform_indices = @transform_1, window_bounds = array<i64: 16, 32>}, {pipeline_mode = #tpu.pipeline_mode<synchronous>, transform_indices = @transform_2, window_bounds = array<i64: 2, 1, 8, 8>}, {pipeline_mode = #tpu.pipeline_mode<synchronous>, transform_indices = @transform_3, window_bounds = array<i64: 2, 4, 8, 8>}, {pipeline_mode = #tpu.pipeline_mode<synchronous>, transform_indices = @transform_4, window_bounds = array<i64: 32, 96>}, {pipeline_mode = #tpu.pipeline_mode<synchronous>, transform_indices = @transform_5, window_bounds = array<i64: 32, 32>}, {pipeline_mode = #tpu.pipeline_mode<synchronous>, transform_indices = @transform_6, window_bounds = array<i64: 32, 128>}, {pipeline_mode = #tpu.pipeline_mode<synchronous>, transform_indices = @transform_7, window_bounds = array<i64: 128, 32>}, {pipeline_mode = #tpu.pipeline_mode<synchronous>, transform_indices = @transform_8, window_bounds = array<i64: 4, 128>}, {pipeline_mode = #tpu.pipeline_mode<synchronous>, transform_indices = @transform_9, window_bounds = array<i64: 4, 32>}, {pipeline_mode = #tpu.pipeline_mode<synchronous>, transform_indices = @transform_10, window_bounds = array<i64: 16, 32>}, {pipeline_mode = #tpu.pipeline_mode<synchronous>, transform_indices = @transform_11, window_bounds = array<i64: 2, 4, 8, 8>}]} {
    %c0 = arith.constant 0 : index
    %c0_0 = arith.constant 0 : index
    %0 = vector.load %arg1[%c0, %c0_0] : memref<16x32xf32, #tpu.memory_space<vmem>>, vector<16x32xf32>
    %c0_1 = arith.constant 0 : index
    %c0_2 = arith.constant 0 : index
    %1 = vector.load %arg2[%c0_1, %c0_2] : memref<16x32xf32, #tpu.memory_space<vmem>>, vector<16x32xf32>
    %c0_3 = arith.constant 0 : index
    %c0_4 = arith.constant 0 : index
    %c0_5 = arith.constant 0 : index
    %c0_6 = arith.constant 0 : index
    %2 = vector.load %arg3[%c0_3, %c0_4, %c0_5, %c0_6] : memref<2x1x8x8xf32, #tpu.memory_space<vmem>>, vector<2x1x8x8xf32>
    %c0_7 = arith.constant 0 : index
    %c0_8 = arith.constant 0 : index
    %c0_9 = arith.constant 0 : index
    %c0_10 = arith.constant 0 : index
    %3 = vector.load %arg4[%c0_7, %c0_8, %c0_9, %c0_10] : memref<2x4x8x8xf32, #tpu.memory_space<vmem>>, vector<2x4x8x8xf32>
    %c0_11 = arith.constant 0 : index
    %c0_12 = arith.constant 0 : index
    %4 = vector.load %arg6[%c0_11, %c0_12] : memref<32x32xbf16, #tpu.memory_space<vmem>>, vector<32x32xbf16>
    %c0_13 = arith.constant 0 : index
    %c0_14 = arith.constant 0 : index
    %5 = vector.load %arg9[%c0_13, %c0_14] : memref<4x128xf32, #tpu.memory_space<vmem>>, vector<4x128xf32>
    %c0_15 = arith.constant 0 : index
    %c0_16 = arith.constant 0 : index
    %6 = vector.load %arg10[%c0_15, %c0_16] : memref<4x32xf32, #tpu.memory_space<vmem>>, vector<4x32xf32>
    %7 = vector.extract_strided_slice %5 {offsets = [0, 0], sizes = [1, 96], strides = [1, 1]} : vector<4x128xf32> to vector<1x96xf32>
    %8 = vector.extract_strided_slice %5 {offsets = [1, 0], sizes = [1, 32], strides = [1, 1]} : vector<4x128xf32> to vector<1x32xf32>
    %9 = vector.extract_strided_slice %5 {offsets = [2, 0], sizes = [1, 128], strides = [1, 1]} : vector<4x128xf32> to vector<1x128xf32>
    %10 = vector.extract_strided_slice %5 {offsets = [3, 0], sizes = [1, 32], strides = [1, 1]} : vector<4x128xf32> to vector<1x32xf32>
    %11 = vector.extract_strided_slice %6 {offsets = [0, 0], sizes = [1, 32], strides = [1, 1]} : vector<4x32xf32> to vector<1x32xf32>
    %12 = vector.extract_strided_slice %6 {offsets = [1, 0], sizes = [1, 32], strides = [1, 1]} : vector<4x32xf32> to vector<1x32xf32>
    %13 = vector.extract_strided_slice %6 {offsets = [2, 0], sizes = [1, 32], strides = [1, 1]} : vector<4x32xf32> to vector<1x32xf32>
    %14 = vector.extract_strided_slice %6 {offsets = [3, 0], sizes = [1, 32], strides = [1, 1]} : vector<4x32xf32> to vector<1x32xf32>
    %cst = arith.constant dense<0.000000e+00> : vector<16xf32>
    %15 = vector.multi_reduction <add>, %0, %cst [1] : vector<16x32xf32> to vector<16xf32>
    %16 = vector.shape_cast %15 : vector<16xf32> to vector<16x1xf32>
    %cst_17 = arith.constant 3.200000e+01 : f32
    %17 = vector.broadcast %cst_17 : f32 to vector<16x1xf32>
    %18 = arith.divf %16, %17 : vector<16x1xf32>
    %19 = vector.broadcast %18 : vector<16x1xf32> to vector<16x32xf32>
    %20 = arith.subf %0, %19 : vector<16x32xf32>
    %21 = arith.mulf %20, %20 : vector<16x32xf32>
    %cst_18 = arith.constant dense<0.000000e+00> : vector<16xf32>
    %22 = vector.multi_reduction <add>, %21, %cst_18 [1] : vector<16x32xf32> to vector<16xf32>
    %23 = vector.shape_cast %22 : vector<16xf32> to vector<16x1xf32>
    %cst_19 = arith.constant 3.200000e+01 : f32
    %24 = vector.broadcast %cst_19 : f32 to vector<16x1xf32>
    %25 = arith.divf %23, %24 : vector<16x1xf32>
    %26 = vector.broadcast %18 : vector<16x1xf32> to vector<16x32xf32>
    %27 = arith.subf %0, %26 : vector<16x32xf32>
    %cst_20 = arith.constant 9.99999997E-7 : f32
    %28 = vector.broadcast %cst_20 : f32 to vector<16x1xf32>
    %29 = arith.addf %25, %28 : vector<16x1xf32>
    %30 = math.rsqrt %29 : vector<16x1xf32>
    %31 = vector.broadcast %30 : vector<16x1xf32> to vector<16x32xf32>
    %32 = arith.mulf %27, %31 : vector<16x32xf32>
    %33 = vector.broadcast %11 : vector<1x32xf32> to vector<16x32xf32>
    %34 = arith.mulf %32, %33 : vector<16x32xf32>
    %35 = vector.broadcast %12 : vector<1x32xf32> to vector<16x32xf32>
    %36 = arith.addf %34, %35 : vector<16x32xf32>
    %37 = arith.addf %36, %1 : vector<16x32xf32>
    %38 = arith.truncf %37 : vector<16x32xf32> to vector<16x32xbf16>
    %c0_21 = arith.constant 0 : index
    %c0_22 = arith.constant 0 : index
    %39 = vector.load %arg5[%c0_21, %c0_22] : memref<32x96xbf16, #tpu.memory_space<vmem>>, vector<32x96xbf16>
    %cst_23 = arith.constant dense<0.000000e+00> : vector<16x96xf32>
    %40 = tpu.matmul %38, %39, %cst_23 {dimension_numbers = #tpu.dot_dimension_numbers<[1], [0], [0], [1], [0, 0, 1, 1], [], []>} : vector<16x32xbf16>, vector<32x96xbf16>, vector<16x96xf32> -> vector<16x96xf32>
    %41 = vector.broadcast %7 : vector<1x96xf32> to vector<16x96xf32>
    %42 = arith.addf %40, %41 : vector<16x96xf32>
    %43 = vector.extract_strided_slice %42 {offsets = [0, 0], sizes = [8, 96], strides = [1, 1]} : vector<16x96xf32> to vector<8x96xf32>
    %44 = vector.extract_strided_slice %2 {offsets = [0, 0, 0, 0], sizes = [1, 1, 8, 8], strides = [1, 1, 1, 1]} : vector<2x1x8x8xf32> to vector<1x1x8x8xf32>
    %45 = vector.shape_cast %44 : vector<1x1x8x8xf32> to vector<8x8xf32>
    %cst_24 = arith.constant 0.000000e+00 : f32
    %46 = vector.broadcast %cst_24 : f32 to vector<8x8xf32>
    %47 = arith.cmpf oeq, %45, %46 : vector<8x8xf32>
    %cst_25 = arith.constant 0.000000e+00 : f32
    %48 = vector.broadcast %cst_25 : f32 to vector<8x32xf32>
    %49 = vector.extract_strided_slice %43 {offsets = [0, 0], sizes = [8, 8], strides = [1, 1]} : vector<8x96xf32> to vector<8x8xf32>
    %50 = vector.extract_strided_slice %43 {offsets = [0, 32], sizes = [8, 8], strides = [1, 1]} : vector<8x96xf32> to vector<8x8xf32>
    %51 = vector.extract_strided_slice %43 {offsets = [0, 64], sizes = [8, 8], strides = [1, 1]} : vector<8x96xf32> to vector<8x8xf32>
    %cst_26 = arith.constant dense<0.000000e+00> : vector<8x8xf32>
    %52 = tpu.matmul %49, %50, %cst_26 {dimension_numbers = #tpu.dot_dimension_numbers<[1], [1], [0], [0], [0, 0, 1, 0], [], []>} : vector<8x8xf32>, vector<8x8xf32>, vector<8x8xf32> -> vector<8x8xf32>
    %cst_27 = arith.constant 0.353553385 : f32
    %53 = vector.broadcast %cst_27 : f32 to vector<8x8xf32>
    %54 = arith.mulf %52, %53 : vector<8x8xf32>
    %55 = vector.extract_strided_slice %3 {offsets = [0, 0, 0, 0], sizes = [1, 1, 8, 8], strides = [1, 1, 1, 1]} : vector<2x4x8x8xf32> to vector<1x1x8x8xf32>
    %56 = vector.shape_cast %55 : vector<1x1x8x8xf32> to vector<8x8xf32>
    %57 = arith.addf %54, %56 : vector<8x8xf32>
    %cst_28 = arith.constant -1.000000e+09 : f32
    %58 = vector.broadcast %cst_28 : f32 to vector<8x8xf32>
    %59 = arith.select %47, %58, %57 : vector<8x8xi1>, vector<8x8xf32>
    %cst_29 = arith.constant dense<0xFF800000> : vector<8xf32>
    %60 = vector.multi_reduction <maximumf>, %59, %cst_29 [1] : vector<8x8xf32> to vector<8xf32>
    %61 = vector.shape_cast %60 : vector<8xf32> to vector<8x1xf32>
    %62 = vector.broadcast %61 : vector<8x1xf32> to vector<8x8xf32>
    %63 = arith.subf %59, %62 : vector<8x8xf32>
    %64 = math.exp %63 : vector<8x8xf32>
    %cst_30 = arith.constant dense<0.000000e+00> : vector<8xf32>
    %65 = vector.multi_reduction <add>, %64, %cst_30 [1] : vector<8x8xf32> to vector<8xf32>
    %66 = vector.shape_cast %65 : vector<8xf32> to vector<8x1xf32>
    %67 = vector.broadcast %66 : vector<8x1xf32> to vector<8x8xf32>
    %68 = arith.divf %64, %67 : vector<8x8xf32>
    %cst_31 = arith.constant dense<0.000000e+00> : vector<8x8xf32>
    %69 = tpu.matmul %68, %51, %cst_31 {dimension_numbers = #tpu.dot_dimension_numbers<[1], [0], [0], [1], [0, 0, 1, 1], [], []>} : vector<8x8xf32>, vector<8x8xf32>, vector<8x8xf32> -> vector<8x8xf32>
    %70 = arith.truncf %69 : vector<8x8xf32> to vector<8x8xbf16>
    %71 = vector.extract_strided_slice %4 {offsets = [0, 0], sizes = [8, 32], strides = [1, 1]} : vector<32x32xbf16> to vector<8x32xbf16>
    %cst_32 = arith.constant dense<0.000000e+00> : vector<8x32xf32>
    %72 = tpu.matmul %70, %71, %cst_32 {dimension_numbers = #tpu.dot_dimension_numbers<[1], [0], [0], [1], [0, 0, 1, 1], [], []>} : vector<8x8xbf16>, vector<8x32xbf16>, vector<8x32xf32> -> vector<8x32xf32>
    %73 = arith.addf %48, %72 : vector<8x32xf32>
    %74 = vector.extract_strided_slice %43 {offsets = [0, 8], sizes = [8, 8], strides = [1, 1]} : vector<8x96xf32> to vector<8x8xf32>
    %75 = vector.extract_strided_slice %43 {offsets = [0, 40], sizes = [8, 8], strides = [1, 1]} : vector<8x96xf32> to vector<8x8xf32>
    %76 = vector.extract_strided_slice %43 {offsets = [0, 72], sizes = [8, 8], strides = [1, 1]} : vector<8x96xf32> to vector<8x8xf32>
    %cst_33 = arith.constant dense<0.000000e+00> : vector<8x8xf32>
    %77 = tpu.matmul %74, %75, %cst_33 {dimension_numbers = #tpu.dot_dimension_numbers<[1], [1], [0], [0], [0, 0, 1, 0], [], []>} : vector<8x8xf32>, vector<8x8xf32>, vector<8x8xf32> -> vector<8x8xf32>
    %cst_34 = arith.constant 0.353553385 : f32
    %78 = vector.broadcast %cst_34 : f32 to vector<8x8xf32>
    %79 = arith.mulf %77, %78 : vector<8x8xf32>
    %80 = vector.extract_strided_slice %3 {offsets = [0, 1, 0, 0], sizes = [1, 1, 8, 8], strides = [1, 1, 1, 1]} : vector<2x4x8x8xf32> to vector<1x1x8x8xf32>
    %81 = vector.shape_cast %80 : vector<1x1x8x8xf32> to vector<8x8xf32>
    %82 = arith.addf %79, %81 : vector<8x8xf32>
    %cst_35 = arith.constant -1.000000e+09 : f32
    %83 = vector.broadcast %cst_35 : f32 to vector<8x8xf32>
    %84 = arith.select %47, %83, %82 : vector<8x8xi1>, vector<8x8xf32>
    %cst_36 = arith.constant dense<0xFF800000> : vector<8xf32>
    %85 = vector.multi_reduction <maximumf>, %84, %cst_36 [1] : vector<8x8xf32> to vector<8xf32>
    %86 = vector.shape_cast %85 : vector<8xf32> to vector<8x1xf32>
    %87 = vector.broadcast %86 : vector<8x1xf32> to vector<8x8xf32>
    %88 = arith.subf %84, %87 : vector<8x8xf32>
    %89 = math.exp %88 : vector<8x8xf32>
    %cst_37 = arith.constant dense<0.000000e+00> : vector<8xf32>
    %90 = vector.multi_reduction <add>, %89, %cst_37 [1] : vector<8x8xf32> to vector<8xf32>
    %91 = vector.shape_cast %90 : vector<8xf32> to vector<8x1xf32>
    %92 = vector.broadcast %91 : vector<8x1xf32> to vector<8x8xf32>
    %93 = arith.divf %89, %92 : vector<8x8xf32>
    %cst_38 = arith.constant dense<0.000000e+00> : vector<8x8xf32>
    %94 = tpu.matmul %93, %76, %cst_38 {dimension_numbers = #tpu.dot_dimension_numbers<[1], [0], [0], [1], [0, 0, 1, 1], [], []>} : vector<8x8xf32>, vector<8x8xf32>, vector<8x8xf32> -> vector<8x8xf32>
    %95 = arith.truncf %94 : vector<8x8xf32> to vector<8x8xbf16>
    %96 = vector.extract_strided_slice %4 {offsets = [8, 0], sizes = [8, 32], strides = [1, 1]} : vector<32x32xbf16> to vector<8x32xbf16>
    %cst_39 = arith.constant dense<0.000000e+00> : vector<8x32xf32>
    %97 = tpu.matmul %95, %96, %cst_39 {dimension_numbers = #tpu.dot_dimension_numbers<[1], [0], [0], [1], [0, 0, 1, 1], [], []>} : vector<8x8xbf16>, vector<8x32xbf16>, vector<8x32xf32> -> vector<8x32xf32>
    %98 = arith.addf %73, %97 : vector<8x32xf32>
    %99 = vector.extract_strided_slice %43 {offsets = [0, 16], sizes = [8, 8], strides = [1, 1]} : vector<8x96xf32> to vector<8x8xf32>
    %100 = vector.extract_strided_slice %43 {offsets = [0, 48], sizes = [8, 8], strides = [1, 1]} : vector<8x96xf32> to vector<8x8xf32>
    %101 = vector.extract_strided_slice %43 {offsets = [0, 80], sizes = [8, 8], strides = [1, 1]} : vector<8x96xf32> to vector<8x8xf32>
    %cst_40 = arith.constant dense<0.000000e+00> : vector<8x8xf32>
    %102 = tpu.matmul %99, %100, %cst_40 {dimension_numbers = #tpu.dot_dimension_numbers<[1], [1], [0], [0], [0, 0, 1, 0], [], []>} : vector<8x8xf32>, vector<8x8xf32>, vector<8x8xf32> -> vector<8x8xf32>
    %cst_41 = arith.constant 0.353553385 : f32
    %103 = vector.broadcast %cst_41 : f32 to vector<8x8xf32>
    %104 = arith.mulf %102, %103 : vector<8x8xf32>
    %105 = vector.extract_strided_slice %3 {offsets = [0, 2, 0, 0], sizes = [1, 1, 8, 8], strides = [1, 1, 1, 1]} : vector<2x4x8x8xf32> to vector<1x1x8x8xf32>
    %106 = vector.shape_cast %105 : vector<1x1x8x8xf32> to vector<8x8xf32>
    %107 = arith.addf %104, %106 : vector<8x8xf32>
    %cst_42 = arith.constant -1.000000e+09 : f32
    %108 = vector.broadcast %cst_42 : f32 to vector<8x8xf32>
    %109 = arith.select %47, %108, %107 : vector<8x8xi1>, vector<8x8xf32>
    %cst_43 = arith.constant dense<0xFF800000> : vector<8xf32>
    %110 = vector.multi_reduction <maximumf>, %109, %cst_43 [1] : vector<8x8xf32> to vector<8xf32>
    %111 = vector.shape_cast %110 : vector<8xf32> to vector<8x1xf32>
    %112 = vector.broadcast %111 : vector<8x1xf32> to vector<8x8xf32>
    %113 = arith.subf %109, %112 : vector<8x8xf32>
    %114 = math.exp %113 : vector<8x8xf32>
    %cst_44 = arith.constant dense<0.000000e+00> : vector<8xf32>
    %115 = vector.multi_reduction <add>, %114, %cst_44 [1] : vector<8x8xf32> to vector<8xf32>
    %116 = vector.shape_cast %115 : vector<8xf32> to vector<8x1xf32>
    %117 = vector.broadcast %116 : vector<8x1xf32> to vector<8x8xf32>
    %118 = arith.divf %114, %117 : vector<8x8xf32>
    %cst_45 = arith.constant dense<0.000000e+00> : vector<8x8xf32>
    %119 = tpu.matmul %118, %101, %cst_45 {dimension_numbers = #tpu.dot_dimension_numbers<[1], [0], [0], [1], [0, 0, 1, 1], [], []>} : vector<8x8xf32>, vector<8x8xf32>, vector<8x8xf32> -> vector<8x8xf32>
    %120 = arith.truncf %119 : vector<8x8xf32> to vector<8x8xbf16>
    %121 = vector.extract_strided_slice %4 {offsets = [16, 0], sizes = [8, 32], strides = [1, 1]} : vector<32x32xbf16> to vector<8x32xbf16>
    %cst_46 = arith.constant dense<0.000000e+00> : vector<8x32xf32>
    %122 = tpu.matmul %120, %121, %cst_46 {dimension_numbers = #tpu.dot_dimension_numbers<[1], [0], [0], [1], [0, 0, 1, 1], [], []>} : vector<8x8xbf16>, vector<8x32xbf16>, vector<8x32xf32> -> vector<8x32xf32>
    %123 = arith.addf %98, %122 : vector<8x32xf32>
    %124 = vector.extract_strided_slice %43 {offsets = [0, 24], sizes = [8, 8], strides = [1, 1]} : vector<8x96xf32> to vector<8x8xf32>
    %125 = vector.extract_strided_slice %43 {offsets = [0, 56], sizes = [8, 8], strides = [1, 1]} : vector<8x96xf32> to vector<8x8xf32>
    %126 = vector.extract_strided_slice %43 {offsets = [0, 88], sizes = [8, 8], strides = [1, 1]} : vector<8x96xf32> to vector<8x8xf32>
    %cst_47 = arith.constant dense<0.000000e+00> : vector<8x8xf32>
    %127 = tpu.matmul %124, %125, %cst_47 {dimension_numbers = #tpu.dot_dimension_numbers<[1], [1], [0], [0], [0, 0, 1, 0], [], []>} : vector<8x8xf32>, vector<8x8xf32>, vector<8x8xf32> -> vector<8x8xf32>
    %cst_48 = arith.constant 0.353553385 : f32
    %128 = vector.broadcast %cst_48 : f32 to vector<8x8xf32>
    %129 = arith.mulf %127, %128 : vector<8x8xf32>
    %130 = vector.extract_strided_slice %3 {offsets = [0, 3, 0, 0], sizes = [1, 1, 8, 8], strides = [1, 1, 1, 1]} : vector<2x4x8x8xf32> to vector<1x1x8x8xf32>
    %131 = vector.shape_cast %130 : vector<1x1x8x8xf32> to vector<8x8xf32>
    %132 = arith.addf %129, %131 : vector<8x8xf32>
    %cst_49 = arith.constant -1.000000e+09 : f32
    %133 = vector.broadcast %cst_49 : f32 to vector<8x8xf32>
    %134 = arith.select %47, %133, %132 : vector<8x8xi1>, vector<8x8xf32>
    %cst_50 = arith.constant dense<0xFF800000> : vector<8xf32>
    %135 = vector.multi_reduction <maximumf>, %134, %cst_50 [1] : vector<8x8xf32> to vector<8xf32>
    %136 = vector.shape_cast %135 : vector<8xf32> to vector<8x1xf32>
    %137 = vector.broadcast %136 : vector<8x1xf32> to vector<8x8xf32>
    %138 = arith.subf %134, %137 : vector<8x8xf32>
    %139 = math.exp %138 : vector<8x8xf32>
    %cst_51 = arith.constant dense<0.000000e+00> : vector<8xf32>
    %140 = vector.multi_reduction <add>, %139, %cst_51 [1] : vector<8x8xf32> to vector<8xf32>
    %141 = vector.shape_cast %140 : vector<8xf32> to vector<8x1xf32>
    %142 = vector.broadcast %141 : vector<8x1xf32> to vector<8x8xf32>
    %143 = arith.divf %139, %142 : vector<8x8xf32>
    %cst_52 = arith.constant dense<0.000000e+00> : vector<8x8xf32>
    %144 = tpu.matmul %143, %126, %cst_52 {dimension_numbers = #tpu.dot_dimension_numbers<[1], [0], [0], [1], [0, 0, 1, 1], [], []>} : vector<8x8xf32>, vector<8x8xf32>, vector<8x8xf32> -> vector<8x8xf32>
    %145 = arith.truncf %144 : vector<8x8xf32> to vector<8x8xbf16>
    %146 = vector.extract_strided_slice %4 {offsets = [24, 0], sizes = [8, 32], strides = [1, 1]} : vector<32x32xbf16> to vector<8x32xbf16>
    %cst_53 = arith.constant dense<0.000000e+00> : vector<8x32xf32>
    %147 = tpu.matmul %145, %146, %cst_53 {dimension_numbers = #tpu.dot_dimension_numbers<[1], [0], [0], [1], [0, 0, 1, 1], [], []>} : vector<8x8xbf16>, vector<8x32xbf16>, vector<8x32xf32> -> vector<8x32xf32>
    %148 = arith.addf %123, %147 : vector<8x32xf32>
    %149 = vector.extract_strided_slice %42 {offsets = [8, 0], sizes = [8, 96], strides = [1, 1]} : vector<16x96xf32> to vector<8x96xf32>
    %150 = vector.extract_strided_slice %2 {offsets = [1, 0, 0, 0], sizes = [1, 1, 8, 8], strides = [1, 1, 1, 1]} : vector<2x1x8x8xf32> to vector<1x1x8x8xf32>
    %151 = vector.shape_cast %150 : vector<1x1x8x8xf32> to vector<8x8xf32>
    %cst_54 = arith.constant 0.000000e+00 : f32
    %152 = vector.broadcast %cst_54 : f32 to vector<8x8xf32>
    %153 = arith.cmpf oeq, %151, %152 : vector<8x8xf32>
    %cst_55 = arith.constant 0.000000e+00 : f32
    %154 = vector.broadcast %cst_55 : f32 to vector<8x32xf32>
    %155 = vector.extract_strided_slice %149 {offsets = [0, 0], sizes = [8, 8], strides = [1, 1]} : vector<8x96xf32> to vector<8x8xf32>
    %156 = vector.extract_strided_slice %149 {offsets = [0, 32], sizes = [8, 8], strides = [1, 1]} : vector<8x96xf32> to vector<8x8xf32>
    %157 = vector.extract_strided_slice %149 {offsets = [0, 64], sizes = [8, 8], strides = [1, 1]} : vector<8x96xf32> to vector<8x8xf32>
    %cst_56 = arith.constant dense<0.000000e+00> : vector<8x8xf32>
    %158 = tpu.matmul %155, %156, %cst_56 {dimension_numbers = #tpu.dot_dimension_numbers<[1], [1], [0], [0], [0, 0, 1, 0], [], []>} : vector<8x8xf32>, vector<8x8xf32>, vector<8x8xf32> -> vector<8x8xf32>
    %cst_57 = arith.constant 0.353553385 : f32
    %159 = vector.broadcast %cst_57 : f32 to vector<8x8xf32>
    %160 = arith.mulf %158, %159 : vector<8x8xf32>
    %161 = vector.extract_strided_slice %3 {offsets = [1, 0, 0, 0], sizes = [1, 1, 8, 8], strides = [1, 1, 1, 1]} : vector<2x4x8x8xf32> to vector<1x1x8x8xf32>
    %162 = vector.shape_cast %161 : vector<1x1x8x8xf32> to vector<8x8xf32>
    %163 = arith.addf %160, %162 : vector<8x8xf32>
    %cst_58 = arith.constant -1.000000e+09 : f32
    %164 = vector.broadcast %cst_58 : f32 to vector<8x8xf32>
    %165 = arith.select %153, %164, %163 : vector<8x8xi1>, vector<8x8xf32>
    %cst_59 = arith.constant dense<0xFF800000> : vector<8xf32>
    %166 = vector.multi_reduction <maximumf>, %165, %cst_59 [1] : vector<8x8xf32> to vector<8xf32>
    %167 = vector.shape_cast %166 : vector<8xf32> to vector<8x1xf32>
    %168 = vector.broadcast %167 : vector<8x1xf32> to vector<8x8xf32>
    %169 = arith.subf %165, %168 : vector<8x8xf32>
    %170 = math.exp %169 : vector<8x8xf32>
    %cst_60 = arith.constant dense<0.000000e+00> : vector<8xf32>
    %171 = vector.multi_reduction <add>, %170, %cst_60 [1] : vector<8x8xf32> to vector<8xf32>
    %172 = vector.shape_cast %171 : vector<8xf32> to vector<8x1xf32>
    %173 = vector.broadcast %172 : vector<8x1xf32> to vector<8x8xf32>
    %174 = arith.divf %170, %173 : vector<8x8xf32>
    %cst_61 = arith.constant dense<0.000000e+00> : vector<8x8xf32>
    %175 = tpu.matmul %174, %157, %cst_61 {dimension_numbers = #tpu.dot_dimension_numbers<[1], [0], [0], [1], [0, 0, 1, 1], [], []>} : vector<8x8xf32>, vector<8x8xf32>, vector<8x8xf32> -> vector<8x8xf32>
    %176 = arith.truncf %175 : vector<8x8xf32> to vector<8x8xbf16>
    %177 = vector.extract_strided_slice %4 {offsets = [0, 0], sizes = [8, 32], strides = [1, 1]} : vector<32x32xbf16> to vector<8x32xbf16>
    %cst_62 = arith.constant dense<0.000000e+00> : vector<8x32xf32>
    %178 = tpu.matmul %176, %177, %cst_62 {dimension_numbers = #tpu.dot_dimension_numbers<[1], [0], [0], [1], [0, 0, 1, 1], [], []>} : vector<8x8xbf16>, vector<8x32xbf16>, vector<8x32xf32> -> vector<8x32xf32>
    %179 = arith.addf %154, %178 : vector<8x32xf32>
    %180 = vector.extract_strided_slice %149 {offsets = [0, 8], sizes = [8, 8], strides = [1, 1]} : vector<8x96xf32> to vector<8x8xf32>
    %181 = vector.extract_strided_slice %149 {offsets = [0, 40], sizes = [8, 8], strides = [1, 1]} : vector<8x96xf32> to vector<8x8xf32>
    %182 = vector.extract_strided_slice %149 {offsets = [0, 72], sizes = [8, 8], strides = [1, 1]} : vector<8x96xf32> to vector<8x8xf32>
    %cst_63 = arith.constant dense<0.000000e+00> : vector<8x8xf32>
    %183 = tpu.matmul %180, %181, %cst_63 {dimension_numbers = #tpu.dot_dimension_numbers<[1], [1], [0], [0], [0, 0, 1, 0], [], []>} : vector<8x8xf32>, vector<8x8xf32>, vector<8x8xf32> -> vector<8x8xf32>
    %cst_64 = arith.constant 0.353553385 : f32
    %184 = vector.broadcast %cst_64 : f32 to vector<8x8xf32>
    %185 = arith.mulf %183, %184 : vector<8x8xf32>
    %186 = vector.extract_strided_slice %3 {offsets = [1, 1, 0, 0], sizes = [1, 1, 8, 8], strides = [1, 1, 1, 1]} : vector<2x4x8x8xf32> to vector<1x1x8x8xf32>
    %187 = vector.shape_cast %186 : vector<1x1x8x8xf32> to vector<8x8xf32>
    %188 = arith.addf %185, %187 : vector<8x8xf32>
    %cst_65 = arith.constant -1.000000e+09 : f32
    %189 = vector.broadcast %cst_65 : f32 to vector<8x8xf32>
    %190 = arith.select %153, %189, %188 : vector<8x8xi1>, vector<8x8xf32>
    %cst_66 = arith.constant dense<0xFF800000> : vector<8xf32>
    %191 = vector.multi_reduction <maximumf>, %190, %cst_66 [1] : vector<8x8xf32> to vector<8xf32>
    %192 = vector.shape_cast %191 : vector<8xf32> to vector<8x1xf32>
    %193 = vector.broadcast %192 : vector<8x1xf32> to vector<8x8xf32>
    %194 = arith.subf %190, %193 : vector<8x8xf32>
    %195 = math.exp %194 : vector<8x8xf32>
    %cst_67 = arith.constant dense<0.000000e+00> : vector<8xf32>
    %196 = vector.multi_reduction <add>, %195, %cst_67 [1] : vector<8x8xf32> to vector<8xf32>
    %197 = vector.shape_cast %196 : vector<8xf32> to vector<8x1xf32>
    %198 = vector.broadcast %197 : vector<8x1xf32> to vector<8x8xf32>
    %199 = arith.divf %195, %198 : vector<8x8xf32>
    %cst_68 = arith.constant dense<0.000000e+00> : vector<8x8xf32>
    %200 = tpu.matmul %199, %182, %cst_68 {dimension_numbers = #tpu.dot_dimension_numbers<[1], [0], [0], [1], [0, 0, 1, 1], [], []>} : vector<8x8xf32>, vector<8x8xf32>, vector<8x8xf32> -> vector<8x8xf32>
    %201 = arith.truncf %200 : vector<8x8xf32> to vector<8x8xbf16>
    %202 = vector.extract_strided_slice %4 {offsets = [8, 0], sizes = [8, 32], strides = [1, 1]} : vector<32x32xbf16> to vector<8x32xbf16>
    %cst_69 = arith.constant dense<0.000000e+00> : vector<8x32xf32>
    %203 = tpu.matmul %201, %202, %cst_69 {dimension_numbers = #tpu.dot_dimension_numbers<[1], [0], [0], [1], [0, 0, 1, 1], [], []>} : vector<8x8xbf16>, vector<8x32xbf16>, vector<8x32xf32> -> vector<8x32xf32>
    %204 = arith.addf %179, %203 : vector<8x32xf32>
    %205 = vector.extract_strided_slice %149 {offsets = [0, 16], sizes = [8, 8], strides = [1, 1]} : vector<8x96xf32> to vector<8x8xf32>
    %206 = vector.extract_strided_slice %149 {offsets = [0, 48], sizes = [8, 8], strides = [1, 1]} : vector<8x96xf32> to vector<8x8xf32>
    %207 = vector.extract_strided_slice %149 {offsets = [0, 80], sizes = [8, 8], strides = [1, 1]} : vector<8x96xf32> to vector<8x8xf32>
    %cst_70 = arith.constant dense<0.000000e+00> : vector<8x8xf32>
    %208 = tpu.matmul %205, %206, %cst_70 {dimension_numbers = #tpu.dot_dimension_numbers<[1], [1], [0], [0], [0, 0, 1, 0], [], []>} : vector<8x8xf32>, vector<8x8xf32>, vector<8x8xf32> -> vector<8x8xf32>
    %cst_71 = arith.constant 0.353553385 : f32
    %209 = vector.broadcast %cst_71 : f32 to vector<8x8xf32>
    %210 = arith.mulf %208, %209 : vector<8x8xf32>
    %211 = vector.extract_strided_slice %3 {offsets = [1, 2, 0, 0], sizes = [1, 1, 8, 8], strides = [1, 1, 1, 1]} : vector<2x4x8x8xf32> to vector<1x1x8x8xf32>
    %212 = vector.shape_cast %211 : vector<1x1x8x8xf32> to vector<8x8xf32>
    %213 = arith.addf %210, %212 : vector<8x8xf32>
    %cst_72 = arith.constant -1.000000e+09 : f32
    %214 = vector.broadcast %cst_72 : f32 to vector<8x8xf32>
    %215 = arith.select %153, %214, %213 : vector<8x8xi1>, vector<8x8xf32>
    %cst_73 = arith.constant dense<0xFF800000> : vector<8xf32>
    %216 = vector.multi_reduction <maximumf>, %215, %cst_73 [1] : vector<8x8xf32> to vector<8xf32>
    %217 = vector.shape_cast %216 : vector<8xf32> to vector<8x1xf32>
    %218 = vector.broadcast %217 : vector<8x1xf32> to vector<8x8xf32>
    %219 = arith.subf %215, %218 : vector<8x8xf32>
    %220 = math.exp %219 : vector<8x8xf32>
    %cst_74 = arith.constant dense<0.000000e+00> : vector<8xf32>
    %221 = vector.multi_reduction <add>, %220, %cst_74 [1] : vector<8x8xf32> to vector<8xf32>
    %222 = vector.shape_cast %221 : vector<8xf32> to vector<8x1xf32>
    %223 = vector.broadcast %222 : vector<8x1xf32> to vector<8x8xf32>
    %224 = arith.divf %220, %223 : vector<8x8xf32>
    %cst_75 = arith.constant dense<0.000000e+00> : vector<8x8xf32>
    %225 = tpu.matmul %224, %207, %cst_75 {dimension_numbers = #tpu.dot_dimension_numbers<[1], [0], [0], [1], [0, 0, 1, 1], [], []>} : vector<8x8xf32>, vector<8x8xf32>, vector<8x8xf32> -> vector<8x8xf32>
    %226 = arith.truncf %225 : vector<8x8xf32> to vector<8x8xbf16>
    %227 = vector.extract_strided_slice %4 {offsets = [16, 0], sizes = [8, 32], strides = [1, 1]} : vector<32x32xbf16> to vector<8x32xbf16>
    %cst_76 = arith.constant dense<0.000000e+00> : vector<8x32xf32>
    %228 = tpu.matmul %226, %227, %cst_76 {dimension_numbers = #tpu.dot_dimension_numbers<[1], [0], [0], [1], [0, 0, 1, 1], [], []>} : vector<8x8xbf16>, vector<8x32xbf16>, vector<8x32xf32> -> vector<8x32xf32>
    %229 = arith.addf %204, %228 : vector<8x32xf32>
    %230 = vector.extract_strided_slice %149 {offsets = [0, 24], sizes = [8, 8], strides = [1, 1]} : vector<8x96xf32> to vector<8x8xf32>
    %231 = vector.extract_strided_slice %149 {offsets = [0, 56], sizes = [8, 8], strides = [1, 1]} : vector<8x96xf32> to vector<8x8xf32>
    %232 = vector.extract_strided_slice %149 {offsets = [0, 88], sizes = [8, 8], strides = [1, 1]} : vector<8x96xf32> to vector<8x8xf32>
    %cst_77 = arith.constant dense<0.000000e+00> : vector<8x8xf32>
    %233 = tpu.matmul %230, %231, %cst_77 {dimension_numbers = #tpu.dot_dimension_numbers<[1], [1], [0], [0], [0, 0, 1, 0], [], []>} : vector<8x8xf32>, vector<8x8xf32>, vector<8x8xf32> -> vector<8x8xf32>
    %cst_78 = arith.constant 0.353553385 : f32
    %234 = vector.broadcast %cst_78 : f32 to vector<8x8xf32>
    %235 = arith.mulf %233, %234 : vector<8x8xf32>
    %236 = vector.extract_strided_slice %3 {offsets = [1, 3, 0, 0], sizes = [1, 1, 8, 8], strides = [1, 1, 1, 1]} : vector<2x4x8x8xf32> to vector<1x1x8x8xf32>
    %237 = vector.shape_cast %236 : vector<1x1x8x8xf32> to vector<8x8xf32>
    %238 = arith.addf %235, %237 : vector<8x8xf32>
    %cst_79 = arith.constant -1.000000e+09 : f32
    %239 = vector.broadcast %cst_79 : f32 to vector<8x8xf32>
    %240 = arith.select %153, %239, %238 : vector<8x8xi1>, vector<8x8xf32>
    %cst_80 = arith.constant dense<0xFF800000> : vector<8xf32>
    %241 = vector.multi_reduction <maximumf>, %240, %cst_80 [1] : vector<8x8xf32> to vector<8xf32>
    %242 = vector.shape_cast %241 : vector<8xf32> to vector<8x1xf32>
    %243 = vector.broadcast %242 : vector<8x1xf32> to vector<8x8xf32>
    %244 = arith.subf %240, %243 : vector<8x8xf32>
    %245 = math.exp %244 : vector<8x8xf32>
    %cst_81 = arith.constant dense<0.000000e+00> : vector<8xf32>
    %246 = vector.multi_reduction <add>, %245, %cst_81 [1] : vector<8x8xf32> to vector<8xf32>
    %247 = vector.shape_cast %246 : vector<8xf32> to vector<8x1xf32>
    %248 = vector.broadcast %247 : vector<8x1xf32> to vector<8x8xf32>
    %249 = arith.divf %245, %248 : vector<8x8xf32>
    %cst_82 = arith.constant dense<0.000000e+00> : vector<8x8xf32>
    %250 = tpu.matmul %249, %232, %cst_82 {dimension_numbers = #tpu.dot_dimension_numbers<[1], [0], [0], [1], [0, 0, 1, 1], [], []>} : vector<8x8xf32>, vector<8x8xf32>, vector<8x8xf32> -> vector<8x8xf32>
    %251 = arith.truncf %250 : vector<8x8xf32> to vector<8x8xbf16>
    %252 = vector.extract_strided_slice %4 {offsets = [24, 0], sizes = [8, 32], strides = [1, 1]} : vector<32x32xbf16> to vector<8x32xbf16>
    %cst_83 = arith.constant dense<0.000000e+00> : vector<8x32xf32>
    %253 = tpu.matmul %251, %252, %cst_83 {dimension_numbers = #tpu.dot_dimension_numbers<[1], [0], [0], [1], [0, 0, 1, 1], [], []>} : vector<8x8xbf16>, vector<8x32xbf16>, vector<8x32xf32> -> vector<8x32xf32>
    %254 = arith.addf %229, %253 : vector<8x32xf32>
    %255 = vector.shape_cast %68 : vector<8x8xf32> to vector<1x8x8xf32>
    %256 = vector.shape_cast %93 : vector<8x8xf32> to vector<1x8x8xf32>
    %257 = vector.shape_cast %118 : vector<8x8xf32> to vector<1x8x8xf32>
    %258 = vector.shape_cast %143 : vector<8x8xf32> to vector<1x8x8xf32>
    %259 = vector.shape_cast %174 : vector<8x8xf32> to vector<1x8x8xf32>
    %260 = vector.shape_cast %199 : vector<8x8xf32> to vector<1x8x8xf32>
    %261 = vector.shape_cast %224 : vector<8x8xf32> to vector<1x8x8xf32>
    %262 = vector.shape_cast %249 : vector<8x8xf32> to vector<1x8x8xf32>
    %263 = tpu.concatenate %255, %256, %257, %258, %259, %260, %261, %262 in 0 : vector<1x8x8xf32>, vector<1x8x8xf32>, vector<1x8x8xf32>, vector<1x8x8xf32>, vector<1x8x8xf32>, vector<1x8x8xf32>, vector<1x8x8xf32>, vector<1x8x8xf32> -> vector<8x8x8xf32>
    %264 = vector.shape_cast %263 : vector<8x8x8xf32> to vector<2x4x8x8xf32>
    %c0_84 = arith.constant 0 : index
    %c0_85 = arith.constant 0 : index
    %c0_86 = arith.constant 0 : index
    %c0_87 = arith.constant 0 : index
    %265 = vector.load %arg12[%c0_84, %c0_85, %c0_86, %c0_87] : memref<2x4x8x8xf32, #tpu.memory_space<vmem>>, vector<2x4x8x8xf32>
    tpu.vector_store %arg12[%c0_84, %c0_85, %c0_86, %c0_87], %264 {strides = array<i32>} : memref<2x4x8x8xf32, #tpu.memory_space<vmem>>, vector<2x4x8x8xf32>,
    %266 = tpu.concatenate %148, %254 in 0 : vector<8x32xf32>, vector<8x32xf32> -> vector<16x32xf32>
    %267 = vector.broadcast %8 : vector<1x32xf32> to vector<16x32xf32>
    %268 = arith.addf %266, %267 : vector<16x32xf32>
    %269 = arith.addf %0, %268 : vector<16x32xf32>
    %cst_88 = arith.constant dense<0.000000e+00> : vector<16xf32>
    %270 = vector.multi_reduction <add>, %269, %cst_88 [1] : vector<16x32xf32> to vector<16xf32>
    %271 = vector.shape_cast %270 : vector<16xf32> to vector<16x1xf32>
    %cst_89 = arith.constant 3.200000e+01 : f32
    %272 = vector.broadcast %cst_89 : f32 to vector<16x1xf32>
    %273 = arith.divf %271, %272 : vector<16x1xf32>
    %274 = vector.broadcast %273 : vector<16x1xf32> to vector<16x32xf32>
    %275 = arith.subf %269, %274 : vector<16x32xf32>
    %276 = arith.mulf %275, %275 : vector<16x32xf32>
    %cst_90 = arith.constant dense<0.000000e+00> : vector<16xf32>
    %277 = vector.multi_reduction <add>, %276, %cst_90 [1] : vector<16x32xf32> to vector<16xf32>
    %278 = vector.shape_cast %277 : vector<16xf32> to vector<16x1xf32>
    %cst_91 = arith.constant 3.200000e+01 : f32
    %279 = vector.broadcast %cst_91 : f32 to vector<16x1xf32>
    %280 = arith.divf %278, %279 : vector<16x1xf32>
    %281 = vector.broadcast %273 : vector<16x1xf32> to vector<16x32xf32>
    %282 = arith.subf %269, %281 : vector<16x32xf32>
    %cst_92 = arith.constant 9.99999997E-7 : f32
    %283 = vector.broadcast %cst_92 : f32 to vector<16x1xf32>
    %284 = arith.addf %280, %283 : vector<16x1xf32>
    %285 = math.rsqrt %284 : vector<16x1xf32>
    %286 = vector.broadcast %285 : vector<16x1xf32> to vector<16x32xf32>
    %287 = arith.mulf %282, %286 : vector<16x32xf32>
    %288 = vector.broadcast %13 : vector<1x32xf32> to vector<16x32xf32>
    %289 = arith.mulf %287, %288 : vector<16x32xf32>
    %290 = vector.broadcast %14 : vector<1x32xf32> to vector<16x32xf32>
    %291 = arith.addf %289, %290 : vector<16x32xf32>
    %292 = arith.truncf %291 : vector<16x32xf32> to vector<16x32xbf16>
    %c0_93 = arith.constant 0 : index
    %c0_94 = arith.constant 0 : index
    %293 = vector.load %arg7[%c0_93, %c0_94] : memref<32x128xbf16, #tpu.memory_space<vmem>>, vector<32x128xbf16>
    %cst_95 = arith.constant dense<0.000000e+00> : vector<16x128xf32>
    %294 = tpu.matmul %292, %293, %cst_95 {dimension_numbers = #tpu.dot_dimension_numbers<[1], [0], [0], [1], [0, 0, 1, 1], [], []>} : vector<16x32xbf16>, vector<32x128xbf16>, vector<16x128xf32> -> vector<16x128xf32>
    %295 = vector.broadcast %9 : vector<1x128xf32> to vector<16x128xf32>
    %296 = arith.addf %294, %295 : vector<16x128xf32>
    %297 = arith.mulf %296, %296 : vector<16x128xf32>
    %298 = arith.mulf %296, %297 : vector<16x128xf32>
    %cst_96 = arith.constant 4.471500e-02 : f32
    %299 = vector.broadcast %cst_96 : f32 to vector<16x128xf32>
    %300 = arith.mulf %299, %298 : vector<16x128xf32>
    %301 = arith.addf %296, %300 : vector<16x128xf32>
    %cst_97 = arith.constant 0.797884583 : f32
    %302 = vector.broadcast %cst_97 : f32 to vector<16x128xf32>
    %303 = arith.mulf %302, %301 : vector<16x128xf32>
    %304 = math.tanh %303 : vector<16x128xf32>
    %cst_98 = arith.constant 1.000000e+00 : f32
    %305 = vector.broadcast %cst_98 : f32 to vector<16x128xf32>
    %306 = arith.addf %305, %304 : vector<16x128xf32>
    %cst_99 = arith.constant 5.000000e-01 : f32
    %307 = vector.broadcast %cst_99 : f32 to vector<16x128xf32>
    %308 = arith.mulf %307, %306 : vector<16x128xf32>
    %309 = arith.mulf %296, %308 : vector<16x128xf32>
    %310 = arith.truncf %309 : vector<16x128xf32> to vector<16x128xbf16>
    %c0_100 = arith.constant 0 : index
    %c0_101 = arith.constant 0 : index
    %311 = vector.load %arg8[%c0_100, %c0_101] : memref<128x32xbf16, #tpu.memory_space<vmem>>, vector<128x32xbf16>
    %cst_102 = arith.constant dense<0.000000e+00> : vector<16x32xf32>
    %312 = tpu.matmul %310, %311, %cst_102 {dimension_numbers = #tpu.dot_dimension_numbers<[1], [0], [0], [1], [0, 0, 1, 1], [], []>} : vector<16x128xbf16>, vector<128x32xbf16>, vector<16x32xf32> -> vector<16x32xf32>
    %313 = vector.broadcast %10 : vector<1x32xf32> to vector<16x32xf32>
    %314 = arith.addf %312, %313 : vector<16x32xf32>
    %315 = arith.addf %269, %314 : vector<16x32xf32>
    %c0_103 = arith.constant 0 : index
    %c0_104 = arith.constant 0 : index
    %316 = vector.load %arg11[%c0_103, %c0_104] : memref<16x32xf32, #tpu.memory_space<vmem>>, vector<16x32xf32>
    tpu.vector_store %arg11[%c0_103, %c0_104], %315 {strides = array<i32>} : memref<16x32xf32, #tpu.memory_space<vmem>>, vector<16x32xf32>,
    return
  }
  func.func @transform_0(%arg0: i32) -> (i32, i32) {
    %c0_i32 = arith.constant 0 : i32
    %c0_i32_0 = arith.constant 0 : i32
    %c0_i32_1 = arith.constant 0 : i32
    return %c0_i32, %c0_i32_0 : i32, i32
  }
  func.func @transform_1(%arg0: i32) -> (i32, i32) {
    %c0_i32 = arith.constant 0 : i32
    %c0_i32_0 = arith.constant 0 : i32
    %c0_i32_1 = arith.constant 0 : i32
    return %c0_i32, %c0_i32_0 : i32, i32
  }
  func.func @transform_2(%arg0: i32) -> (i32, i32, i32, i32) {
    %c0_i32 = arith.constant 0 : i32
    %c0_i32_0 = arith.constant 0 : i32
    %c0_i32_1 = arith.constant 0 : i32
    %c0_i32_2 = arith.constant 0 : i32
    %c0_i32_3 = arith.constant 0 : i32
    return %c0_i32, %c0_i32_0, %c0_i32_1, %c0_i32_2 : i32, i32, i32, i32
  }
  func.func @transform_3(%arg0: i32) -> (i32, i32, i32, i32) {
    %c0_i32 = arith.constant 0 : i32
    %c0_i32_0 = arith.constant 0 : i32
    %c0_i32_1 = arith.constant 0 : i32
    %c0_i32_2 = arith.constant 0 : i32
    %c0_i32_3 = arith.constant 0 : i32
    return %c0_i32, %c0_i32_0, %c0_i32_1, %c0_i32_2 : i32, i32, i32, i32
  }
  func.func @transform_4(%arg0: i32) -> (i32, i32) {
    %c0_i32 = arith.constant 0 : i32
    %c0_i32_0 = arith.constant 0 : i32
    %c0_i32_1 = arith.constant 0 : i32
    return %c0_i32, %c0_i32_0 : i32, i32
  }
  func.func @transform_5(%arg0: i32) -> (i32, i32) {
    %c0_i32 = arith.constant 0 : i32
    %c0_i32_0 = arith.constant 0 : i32
    %c0_i32_1 = arith.constant 0 : i32
    return %c0_i32, %c0_i32_0 : i32, i32
  }
  func.func @transform_6(%arg0: i32) -> (i32, i32) {
    %c0_i32 = arith.constant 0 : i32
    %c0_i32_0 = arith.constant 0 : i32
    %c0_i32_1 = arith.constant 0 : i32
    return %c0_i32, %c0_i32_0 : i32, i32
  }
  func.func @transform_7(%arg0: i32) -> (i32, i32) {
    %c0_i32 = arith.constant 0 : i32
    %c0_i32_0 = arith.constant 0 : i32
    %c0_i32_1 = arith.constant 0 : i32
    return %c0_i32, %c0_i32_0 : i32, i32
  }
  func.func @transform_8(%arg0: i32) -> (i32, i32) {
    %c0_i32 = arith.constant 0 : i32
    %c0_i32_0 = arith.constant 0 : i32
    %c0_i32_1 = arith.constant 0 : i32
    return %c0_i32, %c0_i32_0 : i32, i32
  }
  func.func @transform_9(%arg0: i32) -> (i32, i32) {
    %c0_i32 = arith.constant 0 : i32
    %c0_i32_0 = arith.constant 0 : i32
    %c0_i32_1 = arith.constant 0 : i32
    return %c0_i32, %c0_i32_0 : i32, i32
  }
  func.func @transform_10(%arg0: i32) -> (i32, i32) {
    %c0_i32 = arith.constant 0 : i32
    %c0_i32_0 = arith.constant 0 : i32
    %c0_i32_1 = arith.constant 0 : i32
    return %c0_i32, %c0_i32_0 : i32, i32
  }
  func.func @transform_11(%arg0: i32) -> (i32, i32, i32, i32) {
    %c0_i32 = arith.constant 0 : i32
    %c0_i32_0 = arith.constant 0 : i32
    %c0_i32_1 = arith.constant 0 : i32
    %c0_i32_2 = arith.constant 0 : i32
    %c0_i32_3 = arith.constant 0 : i32
    return %c0_i32, %c0_i32_0, %c0_i32_1, %c0_i32_2 : i32, i32, i32, i32
  }
}

</mosaic_0001>

<bundles_post_ra>
// kernel: tpu_custom_call.1
= control target key start
LH: loop header
LB: loop body
LE: loop exit
PB: predicated region body
PF: predicated region fallthrough
CT: control target
= control target key end

     0   :  { %17 = vsyncpa [#allocation3], 0  ;;  %s3215_s0 = inlined_call_operand.hbm [shape: f32[16,32], index: 0, kind: input, shape index: {}, may-alias: {0,10}]   ;;  %s3216_s1 = inlined_call_operand.vmem [shape: f32[16,32], index: 1, kind: input, shape index: {}]   ;;  %s3217_s2 = inlined_call_operand.vmem [shape: f32[2,1,8,8], index: 2, kind: input, shape index: {}]   ;;  %s3218_s3 = inlined_call_operand.vmem [shape: f32[2,4,8,8], index: 3, kind: input, shape index: {}]   ;;  %s3219_s4 = inlined_call_operand.hbm [shape: bf16[32,96], index: 4, kind: input, shape index: {}]   ;;  %s3220_s5 = inlined_call_operand.vmem [shape: bf16[32,32], index: 5, kind: input, shape index: {}]   ;;  %s3221_s6 = inlined_call_operand.hbm [shape: bf16[32,128], index: 6, kind: input, shape index: {}]   ;;  %s3222_s7 = inlined_call_operand.vmem [shape: bf16[128,32], index: 7, kind: input, shape index: {}]   ;;  %s3223_s8 = inlined_call_operand.vmem [shape: f32[4,128], index: 8, kind: input, shape index: {}]   ;;  %s3224_s9 = inlined_call_operand.vmem [shape: f32[4,32], index: 9, kind: input, shape index: {}]   ;;  %s3225_s10 = inlined_call_operand.hbm [shape: f32[16,32], index: 10, kind: output, shape index: {0}, may-alias: {0,10}]   ;;  %s3226_s11 = inlined_call_operand.hbm [shape: f32[2,4,8,8], index: 11, kind: output, shape index: {1}]  }
   0x1   :  { %18 = vsyncpa [#allocation6], 0 }
   0x2   :  { %19 = vsyncpa [#allocation4], 0 }
   0x3   :  { %20 = vsyncpa [#allocation10], 0  ;;  %s2675_s17 = smov [#allocation5]   ;;  %s2557_s21 = scalar_lea.hbm %s3219_s4, 256 }
   0x4   :  { %s44_s18 = sshll.u32 %s2675_s17, 4  ;;  %p2558_p0 = scmp.ne.s32.totalorder %s3219_s4, %s2557_s21  ;;  %s45_s18 = int_to_ptr.vmem [resolvable:$true] %s44_s18 }
   0x5   :  { %p2561_p1 = scmp.lt.u32.totalorder %s2557_s21, %s3219_s4 }
   0x7   :  { %p2563_p2 = pnand %p2561_p1, %p2558_p0 }
   0x9   :  { %2566 = shalt.err (!%p2563_p2)
}
   0xa   :  { %s2567_s26 = scalar_lea.vmem %s45_s18, 256  ;;  %p2572_p4 = scmp.lt.s32.totalorder %s45_s18, %s45_s18 }
   0xb   :  { %p2568_p3 = scmp.ne.s32.totalorder %s45_s18, %s2567_s26  ;;  %p2573_p5 = scmp.lt.s32.totalorder %s2567_s26, %s2567_s26 }
   0xd   :  { %p2574_p6 = por %p2573_p5, %p2572_p4 }
   0xf   :  { %p2575_p7 = pnand %p2574_p6, %p2568_p3 }
  0x11   :  { %2578 = shalt.err (!%p2575_p7)
}
  0x12   :  { %s2676_s27 = smov 64   ;;  %s2677_s28 = smov 4  }
  0x13   :  { %50 = dma.hbm_to_vmem [thread:$0]  %s3219_s4, 256, %s45_s18, [#allocation6], %s2676_s27, %s2676_s27, %s2677_s28  }
  0x14   :  { %s2678_s12 = smov [#allocation2]   ;;  %s2579_s16 = scalar_lea.hbm %s3215_s0, 256 }
  0x15   :  { %s26_s13 = sshll.u32 %s2678_s12, 4  ;;  %p2580_p8 = scmp.ne.s32.totalorder %s3215_s0, %s2579_s16  ;;  %s27_s13 = int_to_ptr.vmem [resolvable:$true] %s26_s13 }
  0x16   :  { %p2583_p9 = scmp.lt.u32.totalorder %s2579_s16, %s3215_s0 }
  0x18   :  { %p2585_p10 = pnand %p2583_p9, %p2580_p8 }
  0x1a   :  { %2588 = shalt.err (!%p2585_p10)
}
  0x1b   :  { %s2589_s22 = scalar_lea.vmem %s27_s13, 256  ;;  %p2594_p12 = scmp.lt.s32.totalorder %s27_s13, %s27_s13 }
  0x1c   :  { %p2590_p11 = scmp.ne.s32.totalorder %s27_s13, %s2589_s22  ;;  %p2595_p13 = scmp.lt.s32.totalorder %s2589_s22, %s2589_s22 }
  0x1e   :  { %p2596_p0 = por %p2595_p13, %p2594_p12 }
  0x20   :  { %p2597_p1 = pnand %p2596_p0, %p2590_p11 }
  0x22   :  { %2600 = shalt.err (!%p2597_p1)
}
  0x23   :  { %s2679_s4 = smov 128   ;;  %s2680_s18 = smov 8  }
  0x24   :  { %32 = dma.hbm_to_vmem [thread:$0]  %s3215_s0, 256, %s27_s13, [#allocation3], %s2679_s4, %s2679_s4, %s2680_s18  }
  0x25   :  { %s2681_s25 = smov [#allocation7]   ;;  %s2601_s12 = scalar_lea.hbm %s3221_s6, 256 }
  0x26   :  { %s58_s26 = sshll.u32 %s2681_s25, 4  ;;  %p2602_p2 = scmp.ne.s32.totalorder %s3221_s6, %s2601_s12  ;;  %s59_s26 = int_to_ptr.vmem [resolvable:$true] %s58_s26 }
  0x27   :  { %p2605_p3 = scmp.lt.u32.totalorder %s2601_s12, %s3221_s6 }
  0x29   :  { %p2607_p4 = pnand %p2605_p3, %p2602_p2 }
  0x2b   :  { %2610 = shalt.err (!%p2607_p4)
}
  0x2c   :  { %s2611_s19 = scalar_lea.vmem %s59_s26, 256  ;;  %p2616_p6 = scmp.lt.s32.totalorder %s59_s26, %s59_s26 }
  0x2d   :  { %p2612_p5 = scmp.ne.s32.totalorder %s59_s26, %s2611_s19  ;;  %p2617_p7 = scmp.lt.s32.totalorder %s2611_s19, %s2611_s19 }
  0x2f   :  { %p2618_p8 = por %p2617_p7, %p2616_p6 }
  0x31   :  { %p2619_p9 = pnand %p2618_p8, %p2612_p5 }
  0x33   :  { %2622 = shalt.err (!%p2619_p9)
}
  0x34   :  { %64 = dma.hbm_to_vmem [thread:$0]  %s3221_s6, 256, %s59_s26, [#allocation6], %s2676_s27, %s2676_s27, %s2677_s28  }
  0x35   :  { %2667 = dma.done.wait [#allocation3], 256  }
  0x36   :  { %2668 = vsyncadd [#allocation3], 4294967040 }
  0x37   :  { %2669 = dma.done.wait [#allocation6], 512  }
  0x38   :  { %2670 = vsyncadd [#allocation6], 4294966784  ;;  %vm101_vm0 = vcmask 261120   ;;  %v2801_v0 = vld [vmem:[#allocation2] sm:$0xff]  ;;  %v2803_v1 = vld [vmem:[#allocation2 + $0x8] sm:$0xff]  ;;  %v2682_v15 = vmov 0.0   ;;  %v129_v19 = vlaneseq }
  0x39   :  { %v102_v2 = vsel %vm101_vm0, %v2801_v0, 0.0  ;;  %v105_v3 = vsel %vm101_vm0, %v2803_v1, 0.0  ;;  %v2501_v14 = vld [vmem:[#allocation5] sm:$0xff]   ;;  %2316 = vmatprep.subr.bf16.mxu0 %v2682_v15  ;;  %vm2683_vm1 = vmmov 0   ;;  %v2502_v16 = vld [vmem:[#allocation5 + $0x8] sm:$0xff]   ;;  %2329 = vmatprep.subr.mxu1 %v2682_v15  ;;  %s2685_s25 = smov 88  }
  0x3a   :  { %103 = vadd.xlane.f32.xlu0 %v102_v2  ;;  %2320 = vmatprep.mubr.msk.bf16.mxu0 %vm2683_vm1, %v2682_v15  ;;  %v2821_v23 = vshrl.u32 %v129_v19, 7  ;;  %v2827_v26 = vld [vmem:[%s3224_s9] sm:$0xf]  ;;  %v84_v38 = vld [vmem:[%s3216_s1 + $0x8] sm:$0xff]  ;;  %vm212_vm2 = vcmask 64512   ;;  %s2687_s14 = smov 120  }
  0x3b   :  { %2317 = vmatpush3.bf16.msra.mxu0 %v2501_v14  ;;  %2331 = vmatprep.mubr.msk.f32.mxu1 %vm2683_vm1, %v2682_v15  ;;  %v83_v37 = vld [vmem:[%s3216_s1] sm:$0xff]  ;;  %s2684_s1 = smov 96   ;;  %s2688_s15 = smov 112   ;;  %vm550_vm4 = vcmask 1043456  }
  0x3c   :  { %2318 = vmatprep.subr.bf16.mxu0 %v2682_v15  ;;  %v131_v25 = vsub.s32 0, %v2821_v23  ;;  %v137_v28 = vsub.s32 1, %v2821_v23  ;;  %v2846_v43 = vld [vmem:[%s3223_s8] sm:$0xf]  ;;  %s2686_s8 = smov 80   ;;  %s2689_s19 = smov 56  }
  0x3d   :  { %v2868_v52 = vld [vmem:[%s3217_s2] sm:$0xff]  ;;  %s2690_s0 = smov 72   ;;  %s2691_s13 = smov 104  }
  0x3e   :  { %106 = vadd.xlane.f32.xlu0 %v105_v3  ;;  %v132_v27 = vrot.slane %v2827_v26, %v131_v25  ;;  %v138_v32 = vrot.slane %v2827_v26, %v137_v28  ;;  %v151_v44 = vrot.slane %v2846_v43, %v131_v25  ;;  %v87_v53 = vld [vmem:[%s3218_s3] sm:$0xff]  ;;  %vm208_vm3 = vcmp.eq.f32.partialorder %v2868_v52, 0.0  ;;  %s2692_s20 = smov 48   ;;  %s2693_s12 = smov 40  }
  0x3f   :  { %2319 = vmatpush3.bf16.msra.mxu0 %v2502_v16 }
  0x40   :  { %2324 = vmatprep.subr.mxu0 %v2682_v15 }
  0xc7   :  { %v104_v4 = vpop.xlane.xlu0 %103 }
  0xc8   :  { %v109_v5 = vmul.f32 0.03125, %v104_v4 }
  0xca   :  { %v111_v6 = vsub.f32 %v2801_v0, %v109_v5 }
  0xcb   :  { %v107_v7 = vpop.xlane.xlu0 %106 }
  0xcc   :  { %v110_v8 = vmul.f32 0.03125, %v107_v7  ;;  %v113_v9 = vmul.f32 %v111_v6, %v111_v6 }
  0xce   :  { %v112_v10 = vsub.f32 %v2803_v1, %v110_v8  ;;  %v115_v11 = vsel %vm101_vm0, %v113_v9, 0.0 }
  0xcf   :  { %116 = vadd.xlane.f32.xlu1 %v115_v11 }
  0xd0   :  { %v114_v12 = vmul.f32 %v112_v10, %v112_v10 }
  0xd2   :  { %v118_v13 = vsel %vm101_vm0, %v114_v12, 0.0 }
  0xd3   :  { %119 = vadd.xlane.f32.xlu1 %v118_v13  ;;  %v88_v13 = vld [vmem:[%s3218_s3 + $0x8] sm:$0xff] }
 0x15c   :  { %v117_v17 = vpop.xlane.xlu1 %116 }
 0x15d   :  { %v121_v18 = vmul.f32 0.03125, %v117_v17 }
 0x15f   :  { %v123_v20 = vadd.f32 1e-06, %v121_v18 }
 0x160   :  { %v120_v21 = vpop.xlane.xlu1 %119 }
 0x161   :  { %2513 = vrsqrt.f32 %v123_v20  ;;  %v122_v22 = vmul.f32 0.03125, %v120_v21 }
 0x163   :  { %v124_v24 = vadd.f32 1e-06, %v122_v22 }
 0x165   :  { %2515 = vrsqrt.f32 %v124_v24 }
 0x16b   :  { %v2514_v29 = vpop.eup %2513 }
 0x16c   :  { %v127_v30 = vmul.f32 %v2514_v29, %v111_v6 }
 0x16e   :  { %v133_v31 = vmul.f32 %v132_v27, %v127_v30 }
 0x16f   :  { %v2516_v33 = vpop.eup %2515 }
 0x170   :  { %v128_v34 = vmul.f32 %v2516_v33, %v112_v10  ;;  %v139_v36 = vadd.f32 %v138_v32, %v133_v31  ;;  %v89_v31 = vld [vmem:[%s3218_s3 + $0x10] sm:$0xff] }
 0x172   :  { %v134_v35 = vmul.f32 %v132_v27, %v128_v34  ;;  %v141_v40 = vadd.f32 %v139_v36, %v83_v37 }
 0x174   :  { %v140_v39 = vadd.f32 %v138_v32, %v134_v35 }
 0x176   :  { %v142_v41 = vadd.f32 %v140_v39, %v84_v38 }
 0x178   :  { %v143_v42 = vpack.c.bf16 %v142_v41, %v141_v40 }
 0x17a   :  { %2321 = vmatmul.mubr.msk.bf16.vlgmr.msra.gmra.mrb[0].mxu0 %vm101_vm0, %v143_v42 }
 0x17b   :  { %2326 = vmatprep.mubr.msk.f32.mxu0 %vm2683_vm1, %v2682_v15 }
 0x24d   :  { %v201_v45 = vpop.f32.mrb[0].mxu0 }
 0x24e   :  { %v2849_v46 = vadd.f32 %v201_v45, %v151_v44  ;;  %v2322_v47 = vpop.f32.mrb[1].mxu0 }
 0x24f   :  { %v204_v48 = vpop.f32.mrb[2].mxu0  ;;  %v96_v47 = vld [vmem:[%s3220_s5 + $0x4] sm:$0xf] }
 0x250   :  { %v2851_v49 = vadd.f32 %v204_v48, %v151_v44  ;;  %210 = vrot.lane.b32.xlu0 %v2849_v46, %s2684_s1  ;;  %v2323_v50 = vpop.f32.mrb[3].mxu0  ;;  %v2932_v48 = vsel %vm550_vm4, %v96_v47, 0  ;;  %v3011_v47 = vld [vmem:[%s3217_s2 + $0x8] sm:$0xff] }
 0x251   :  { %vm1072_vm5 = vcmp.eq.f32.partialorder %v3011_v47, 0.0 }
 0x254   :  { %380 = vrot.lane.b32.xlu0 %v2849_v46, %s2685_s25 }
 0x258   :  { %642 = vrot.lane.b32.xlu0 %v2849_v46, %s2686_s8 }
 0x2c2   :  { %v211_v51 = vpop.permute.xlu0 %210 }
 0x2c3   :  { %2325 = vmatpush3.xpose.msk.msra.mxu0 %vm212_vm2, %v211_v51 }
 0x2c4   :  { %2339 = vmatprep.subr.mxu0 %v2682_v15 }
 0x2c6   :  { %2327 = vmatmul.mubr.msk.f32.vlgmr.msra.gmra.mrb[4].mxu0 %vm212_vm2, %v2849_v46  ;;  %v381_v6 = vpop.permute.xlu0 %380 }
 0x2c7   :  { %2341 = vmatprep.mubr.msk.f32.mxu0 %vm2683_vm1, %v2682_v15 }
 0x2ca   :  { %v643_v9 = vpop.permute.xlu0 %642 }
 0x399   :  { %v283_v54 = vpop.f32.mrb[4].mxu0 }
 0x39a   :  { %v287_v55 = vmul.f32 0.35355338, %v283_v54  ;;  %v2328_v56 = vpop.f32.mrb[5].mxu0  ;;  %v95_v54 = vld [vmem:[%s3220_s5] sm:$0xf] }
 0x39c   :  { %v288_v57 = vadd.f32 %v287_v55, %v87_v53 }
 0x39e   :  { %v289_v58 = vsel %vm208_vm3, -1e+09, %v288_v57 }
 0x39f   :  { %v290_v59 = vsel %vm212_vm2, %v289_v58, -inf }
 0x3a0   :  { %291 = vmax.xlane.f32.xlu1 %v290_v59 }
 0x3b1   :  { %301 = vrot.lane.b32.xlu1 %v2849_v46, %s2676_s27 }
 0x42d   :  { %v292_v60 = vpop.xlane.xlu1 %291 }
 0x42e   :  { %v293_v61 = vsub.f32 %v289_v58, %v292_v60  ;;  %v2941_v58 = vsel %vm550_vm4, %v95_v54, 0 }
 0x430   :  { %v294_v62 = vmul.f32 1.442695, %v293_v61 }
 0x431   :  { %v302_v63 = vpop.permute.xlu1 %301 }
 0x432   :  { %2517 = vpow2.f32 %v294_v62  ;;  %2330 = vmatpush3.msra.mxu1 %v302_v63  ;;  %v97_v63 = vld [vmem:[%s3220_s5 + $0x8] sm:$0xf] }
 0x433   :  { %2334 = vmatprep.subr.mxu1 %v2682_v15 }
 0x43c   :  { %v2518_v2 = vpop.eup %2517 }
 0x43d   :  { %v296_v3 = vsel %vm212_vm2, %v2518_v2, 0.0 }
 0x43e   :  { %297 = vadd.xlane.f32.xlu1 %v296_v3 }
 0x44f   :  { %378 = vrot.lane.b32.xlu1 %v2849_v46, %s2687_s14 }
 0x453   :  { %640 = vrot.lane.b32.xlu1 %v2849_v46, %s2688_s15 }
 0x4cb   :  { %v298_v4 = vpop.xlane.xlu1 %297 }
 0x4cc   :  { %2519 = vrcp.f32 %v298_v4 }
 0x4cf   :  { %v379_v8 = vpop.permute.xlu1 %378 }
 0x4d3   :  { %v641_v10 = vpop.permute.xlu1 %640 }
 0x4d6   :  { %v2520_v5 = vpop.eup %2519 }
 0x4d7   :  { %v300_v7 = vmul.f32 %v2520_v5, %v2518_v2  ;;  %v2966_v2 = vsel %vm550_vm4, %v97_v63, 0 }
 0x4d9   :  { %2332 = vmatmul.mubr.msk.f32.vlgmr.msra.gmra.mrb[0].mxu1 %vm212_vm2, %v300_v7  ;;  %1922 = vst.msk [vmem:[#allocation9] sm:$0xff] %vm212_vm2, %v300_v7 }
 0x4da   :  { %2335 = vmatpush3.xpose.msk.msra.mxu1 %vm212_vm2, %v381_v6  ;;  %2336 = vmatprep.mubr.msk.f32.mxu1 %vm2683_vm1, %v2682_v15 }
 0x4db   :  { %2356 = vmatprep.subr.mxu1 %v2682_v15 }
 0x4dd   :  { %2337 = vmatmul.mubr.msk.f32.vlgmr.msra.gmra.mrb[2].mxu1 %vm212_vm2, %v379_v8 }
 0x4de   :  { %2357 = vmatpush3.xpose.msk.msra.mxu1 %vm212_vm2, %v643_v9  ;;  %2358 = vmatprep.mubr.msk.f32.mxu1 %vm2683_vm1, %v2682_v15 }
 0x4df   :  { %2366 = vmatprep.subr.bf16.mxu1 %v2682_v15 }
 0x4e1   :  { %2359 = vmatmul.mubr.msk.f32.vlgmr.msra.gmra.mrb[4].mxu1 %vm212_vm2, %v641_v10 }
 0x4e2   :  { %2368 = vmatprep.mubr.msk.bf16.mxu1 %vm2683_vm1, %v2682_v15  ;;  %2367 = vmatpush3.bf16.msra.mxu1 %v2966_v2 }
 0x4e3   :  { %2382 = vmatprep.subr.bf16.mxu1 %v2682_v15 }
 0x5ac   :  { %v2899_v11 = vpop.f32.mrb[0].mxu1 }
 0x5ad   :  { %v2333_v12 = vpop.f32.mrb[1].mxu1  ;;  %v377_v59 = vpack.c.bf16 %v2899_v11, %v2899_v11 }
 0x5b0   :  { %v452_v14 = vpop.f32.mrb[2].mxu1 }
 0x5b1   :  { %v456_v16 = vmul.f32 0.35355338, %v452_v14  ;;  %v2338_v17 = vpop.f32.mrb[3].mxu1 }
 0x5b3   :  { %v457_v18 = vadd.f32 %v456_v16, %v88_v13  ;;  %v90_v16 = vld [vmem:[%s3218_s3 + $0x18] sm:$0xff] }
 0x5b4   :  { %v714_v19 = vpop.f32.mrb[4].mxu1 }
 0x5b5   :  { %v2360_v20 = vpop.f32.mrb[5].mxu1  ;;  %v458_v21 = vsel %vm208_vm3, -1e+09, %v457_v18  ;;  %v718_v30 = vmul.f32 0.35355338, %v714_v19 }
 0x5b6   :  { %v459_v22 = vsel %vm212_vm2, %v458_v21, -inf }
 0x5b7   :  { %460 = vmax.xlane.f32.xlu0 %v459_v22  ;;  %v719_v32 = vadd.f32 %v718_v30, %v89_v31 }
 0x5b9   :  { %v720_v35 = vsel %vm208_vm3, -1e+09, %v719_v32 }
 0x5ba   :  { %v721_v36 = vsel %vm212_vm2, %v720_v35, -inf }
 0x5cd   :  { %470 = vrot.lane.b32.xlu0 %v2849_v46, %s2689_s19 }
 0x5d1   :  { %858 = vrot.lane.b32.xlu0 %v2849_v46, %s2690_s0 }
 0x5d5   :  { %856 = vrot.lane.b32.xlu0 %v2849_v46, %s2691_s13 }
 0x644   :  { %v461_v24 = vpop.xlane.xlu0 %460 }
 0x645   :  { %v462_v25 = vsub.f32 %v458_v21, %v461_v24 }
 0x647   :  { %v463_v27 = vmul.f32 1.442695, %v462_v25 }
 0x648   :  { %v471_v29 = vpop.permute.xlu0 %470 }
 0x649   :  { %2521 = vpow2.f32 %v463_v27  ;;  %2340 = vmatpush3.msra.mxu0 %v471_v29 }
 0x64a   :  { %2344 = vmatprep.subr.bf16.mxu0 %v2682_v15 }
 0x64c   :  { %v859_v61 = vpop.permute.xlu0 %858 }
 0x650   :  { %v857_v62 = vpop.permute.xlu0 %856 }
 0x653   :  { %v2522_v33 = vpop.eup %2521 }
 0x654   :  { %v465_v34 = vsel %vm212_vm2, %v2522_v33, 0.0 }
 0x655   :  { %466 = vadd.xlane.f32.xlu1 %v465_v34 }
 0x659   :  { %722 = vmax.xlane.f32.xlu1 %v721_v36 }
 0x6e2   :  { %v467_v37 = vpop.xlane.xlu1 %466 }
 0x6e3   :  { %2523 = vrcp.f32 %v467_v37 }
 0x6e6   :  { %v723_v38 = vpop.xlane.xlu1 %722 }
 0x6e7   :  { %v724_v39 = vsub.f32 %v720_v35, %v723_v38 }
 0x6e9   :  { %v725_v40 = vmul.f32 1.442695, %v724_v39 }
 0x6eb   :  { %2525 = vpow2.f32 %v725_v40 }
 0x6ed   :  { %v2524_v41 = vpop.eup %2523 }
 0x6ee   :  { %v469_v42 = vmul.f32 %v2524_v41, %v2522_v33 }
 0x6f0   :  { %1923 = vst.msk [vmem:[#allocation9 + $0x8] sm:$0xff] %vm212_vm2, %v469_v42  ;;  %2342 = vmatmul.mubr.msk.f32.vlgmr.msra.gmra.mrb[6].mxu0 %vm212_vm2, %v469_v42 }
 0x6f1   :  { %2346 = vmatprep.mubr.msk.bf16.mxu0 %vm2683_vm1, %v2682_v15  ;;  %2345 = vmatpush3.bf16.msra.mxu0 %v2932_v48 }
 0x6f2   :  { %2350 = vmatprep.subr.bf16.mxu0 %v2682_v15 }
 0x6f5   :  { %v2526_v44 = vpop.eup %2525 }
 0x6f6   :  { %v727_v45 = vsel %vm212_vm2, %v2526_v44, 0.0 }
 0x6f7   :  { %728 = vadd.xlane.f32.xlu1 %v727_v45 }
 0x708   :  { %732 = vrot.lane.b32.xlu1 %v2849_v46, %s2692_s20 }
 0x784   :  { %v729_v50 = vpop.xlane.xlu1 %728 }
 0x785   :  { %2527 = vrcp.f32 %v729_v50  ;;  %v91_v50 = vld [vmem:[%s3218_s3 + $0x20] sm:$0xff] }
 0x788   :  { %v733_v60 = vpop.permute.xlu1 %732 }
 0x78f   :  { %v2528_v51 = vpop.eup %2527 }
 0x790   :  { %v731_v53 = vmul.f32 %v2528_v51, %v2526_v44 }
 0x792   :  { %1924 = vst.msk [vmem:[#allocation9 + $0x10] sm:$0xff] %vm212_vm2, %v731_v53 }
 0x7c3   :  { %v542_v55 = vpop.f32.mrb[6].mxu0 }
 0x7c4   :  { %v546_v56 = vpack.c.bf16 %v542_v55, %v542_v55  ;;  %v2343_v57 = vpop.f32.mrb[7].mxu0 }
 0x7c6   :  { %2347 = vmatmul.mubr.msk.bf16.vlgmr.msra.gmra.mrb[8].mxu0 %vm212_vm2, %v546_v56 }
 0x7c7   :  { %2351 = vmatpush3.bf16.msra.mxu0 %v2941_v58  ;;  %2352 = vmatprep.mubr.msk.bf16.mxu0 %vm2683_vm1, %v2682_v15 }
 0x7c8   :  { %2361 = vmatprep.subr.mxu0 %v2682_v15 }
 0x7ce   :  { %2353 = vmatmul.mubr.msk.bf16.vlgmr.msra.gmra.mrb[12].mxu0 %vm212_vm2, %v377_v59 }
 0x7cf   :  { %2362 = vmatpush3.msra.mxu0 %v733_v60  ;;  %2363 = vmatprep.mubr.msk.f32.mxu0 %vm2683_vm1, %v2682_v15 }
 0x7d0   :  { %2372 = vmatprep.subr.mxu0 %v2682_v15 }
 0x7d6   :  { %2364 = vmatmul.mubr.msk.f32.vlgmr.msra.gmra.mrb[16].mxu0 %vm212_vm2, %v731_v53 }
 0x7d7   :  { %2373 = vmatpush3.xpose.msk.msra.mxu0 %vm212_vm2, %v859_v61  ;;  %2374 = vmatprep.mubr.msk.f32.mxu0 %vm2683_vm1, %v2682_v15 }
 0x7d8   :  { %2377 = vmatprep.subr.mxu0 %v2682_v15 }
 0x7da   :  { %2375 = vmatmul.mubr.msk.f32.vlgmr.msra.gmra.mrb[18].mxu0 %vm212_vm2, %v857_v62 }
 0x7db   :  { %2379 = vmatprep.mubr.msk.f32.mxu0 %vm2683_vm1, %v2682_v15 }
 0x899   :  { %v588_v3 = vpop.f32.mrb[8].mxu0 }
 0x89a   :  { %v2348_v4 = vpop.f32.mrb[9].mxu0 }
 0x89b   :  { %v591_v5 = vpop.f32.mrb[10].mxu0 }
 0x89c   :  { %v2349_v6 = vpop.f32.mrb[11].mxu0 }
 0x8a1   :  { %v634_v7 = vpop.f32.mrb[12].mxu0 }
 0x8a2   :  { %v635_v8 = vadd.f32 %v634_v7, %v588_v3  ;;  %v2354_v9 = vpop.f32.mrb[13].mxu0 }
 0x8a3   :  { %v637_v10 = vpop.f32.mrb[14].mxu0 }
 0x8a4   :  { %v2355_v11 = vpop.f32.mrb[15].mxu0 }
 0x8a9   :  { %v804_v12 = vpop.f32.mrb[16].mxu0 }
 0x8aa   :  { %v808_v13 = vpack.c.bf16 %v804_v12, %v804_v12  ;;  %v2365_v14 = vpop.f32.mrb[17].mxu0 }
 0x8ac   :  { %2369 = vmatmul.mubr.msk.bf16.vlgmr.msra.gmra.mrb[8].mxu1 %vm212_vm2, %v808_v13 }
 0x8ad   :  { %v930_v17 = vpop.f32.mrb[18].mxu0  ;;  %2384 = vmatprep.mubr.msk.bf16.mxu1 %vm2683_vm1, %v2682_v15 }
 0x8ae   :  { %v934_v18 = vmul.f32 0.35355338, %v930_v17  ;;  %v2376_v19 = vpop.f32.mrb[19].mxu0 }
 0x8b0   :  { %v935_v20 = vadd.f32 %v934_v18, %v90_v16 }
 0x8b2   :  { %v936_v21 = vsel %vm208_vm3, -1e+09, %v935_v20 }
 0x8b3   :  { %v937_v22 = vsel %vm212_vm2, %v936_v21, -inf }
 0x8b4   :  { %938 = vmax.xlane.f32.xlu0 %v937_v22 }
 0x8ca   :  { %948 = vrot.lane.b32.xlu0 %v2849_v46, %s2693_s12  ;;  %v98_v46 = vld [vmem:[%s3220_s5 + $0xc] sm:$0xf] }
 0x8cb   :  { %v2993_v31 = vsel %vm550_vm4, %v98_v46, 0 }
 0x8cc   :  { %2383 = vmatpush3.bf16.msra.mxu1 %v2993_v31 }
 0x8cd   :  { %2398 = vmatprep.subr.mxu1 %v2682_v15 }
 0x8ce   :  { %1243 = vrot.lane.b32.xlu0 %v2851_v49, %s2685_s25 }
 0x941   :  { %v939_v24 = vpop.xlane.xlu0 %938 }
 0x942   :  { %v940_v25 = vsub.f32 %v936_v21, %v939_v24 }
 0x944   :  { %v941_v27 = vmul.f32 1.442695, %v940_v25 }
 0x945   :  { %v949_v29 = vpop.permute.xlu0 %948 }
 0x946   :  { %2529 = vpow2.f32 %v941_v27  ;;  %2378 = vmatpush3.msra.mxu0 %v949_v29 }
 0x947   :  { %2388 = vmatprep.subr.mxu0 %v2682_v15 }
 0x949   :  { %v1244_v45 = vpop.permute.xlu0 %1243 }
 0x950   :  { %v2530_v52 = vpop.eup %2529 }
 0x951   :  { %v943_v30 = vsel %vm212_vm2, %v2530_v52, 0.0 }
 0x952   :  { %944 = vadd.xlane.f32.xlu1 %v943_v30 }
 0x963   :  { %1074 = vrot.lane.b32.xlu1 %v2851_v49, %s2684_s1 }
 0x967   :  { %1241 = vrot.lane.b32.xlu1 %v2851_v49, %s2687_s14 }
 0x97f   :  { %v849_v32 = vpop.f32.mrb[8].mxu1 }
 0x980   :  { %v855_v33 = vadd.f32 %v849_v32, %v635_v8  ;;  %v2370_v34 = vpop.f32.mrb[9].mxu1 }
 0x981   :  { %v852_v35 = vpop.f32.mrb[10].mxu1 }
 0x982   :  { %v2371_v36 = vpop.f32.mrb[11].mxu1 }
 0x9df   :  { %v945_v37 = vpop.xlane.xlu1 %944 }
 0x9e0   :  { %2531 = vrcp.f32 %v945_v37 }
 0x9e3   :  { %v1075_v40 = vpop.permute.xlu1 %1074 }
 0x9e7   :  { %v1242_v57 = vpop.permute.xlu1 %1241 }
 0x9ea   :  { %v2532_v38 = vpop.eup %2531 }
 0x9eb   :  { %v947_v39 = vmul.f32 %v2532_v38, %v2530_v52 }
 0x9ed   :  { %1925 = vst.msk [vmem:[#allocation9 + $0x18] sm:$0xff] %vm212_vm2, %v947_v39  ;;  %2380 = vmatmul.mubr.msk.f32.vlgmr.msra.gmra.mrb[20].mxu0 %vm212_vm2, %v947_v39 }
 0x9ee   :  { %2389 = vmatpush3.xpose.msk.msra.mxu0 %vm212_vm2, %v1075_v40  ;;  %2390 = vmatprep.mubr.msk.f32.mxu0 %vm2683_vm1, %v2682_v15 }
 0x9ef   :  { %2393 = vmatprep.subr.mxu0 %v2682_v15 }
 0x9f1   :  { %2391 = vmatmul.mubr.msk.f32.vlgmr.msra.gmra.mrb[22].mxu0 %vm212_vm2, %v2851_v49 }
 0x9f2   :  { %2395 = vmatprep.mubr.msk.f32.mxu0 %vm2683_vm1, %v2682_v15 }
 0xac0   :  { %v1020_v41 = vpop.f32.mrb[20].mxu0 }
 0xac1   :  { %v1024_v42 = vpack.c.bf16 %v1020_v41, %v1020_v41  ;;  %v2381_v44 = vpop.f32.mrb[21].mxu0 }
 0xac3   :  { %2385 = vmatmul.mubr.msk.bf16.vlgmr.msra.gmra.mrb[12].mxu1 %vm212_vm2, %v1024_v42 }
 0xac4   :  { %2399 = vmatpush3.xpose.msk.msra.mxu1 %vm212_vm2, %v1244_v45  ;;  %v1146_v51 = vpop.f32.mrb[22].mxu0  ;;  %2400 = vmatprep.mubr.msk.f32.mxu1 %vm2683_vm1, %v2682_v15 }
 0xac5   :  { %v1150_v53 = vmul.f32 0.35355338, %v1146_v51  ;;  %v2392_v54 = vpop.f32.mrb[23].mxu0  ;;  %2408 = vmatprep.subr.bf16.mxu1 %v2682_v15 }
 0xac7   :  { %v1151_v55 = vadd.f32 %v1150_v53, %v91_v50  ;;  %v93_v53 = vld [vmem:[%s3218_s3 + $0x30] sm:$0xff] }
 0xac9   :  { %v1152_v56 = vsel %vm1072_vm5, -1e+09, %v1151_v55 }
 0xaca   :  { %v1153_v59 = vsel %vm212_vm2, %v1152_v56, -inf }
 0xacb   :  { %2401 = vmatmul.mubr.msk.f32.vlgmr.msra.gmra.mrb[6].mxu1 %vm212_vm2, %v1242_v57  ;;  %1154 = vmax.xlane.f32.xlu0 %v1153_v59 }
 0xacc   :  { %2409 = vmatpush3.bf16.msra.mxu1 %v2932_v48  ;;  %2410 = vmatprep.mubr.msk.bf16.mxu1 %vm2683_vm1, %v2682_v15  ;;  %v92_v48 = vld [vmem:[%s3218_s3 + $0x28] sm:$0xff] }
 0xacd   :  { %2420 = vmatprep.subr.mxu1 %v2682_v15 }
 0xb58   :  { %v1155_v60 = vpop.xlane.xlu0 %1154 }
 0xb59   :  { %v1156_v61 = vsub.f32 %v1152_v56, %v1155_v60 }
 0xb5b   :  { %v1157_v62 = vmul.f32 1.442695, %v1156_v61 }
 0xb5d   :  { %2533 = vpow2.f32 %v1157_v62 }
 0xb67   :  { %v2534_v63 = vpop.eup %2533 }
 0xb68   :  { %v1159_v3 = vsel %vm212_vm2, %v2534_v63, 0.0 }
 0xb69   :  { %1160 = vadd.xlane.f32.xlu0 %v1159_v3 }
 0xb96   :  { %v1065_v4 = vpop.f32.mrb[12].mxu1 }
 0xb97   :  { %v3030_v5 = vadd.f32 %v1065_v4, %v855_v33  ;;  %v2386_v6 = vpop.f32.mrb[13].mxu1 }
 0xb98   :  { %v1068_v7 = vpop.f32.mrb[14].mxu1 }
 0xb99   :  { %v2387_v8 = vpop.f32.mrb[15].mxu1 }
 0xb9e   :  { %v1315_v9 = vpop.f32.mrb[6].mxu1 }
 0xb9f   :  { %v1319_v10 = vmul.f32 0.35355338, %v1315_v9  ;;  %v2402_v11 = vpop.f32.mrb[7].mxu1 }
 0xba1   :  { %v1320_v12 = vadd.f32 %v1319_v10, %v92_v48 }
 0xba3   :  { %v1321_v13 = vsel %vm1072_vm5, -1e+09, %v1320_v12 }
 0xba4   :  { %v1322_v14 = vsel %vm212_vm2, %v1321_v13, -inf }
 0xba5   :  { %1323 = vmax.xlane.f32.xlu1 %v1322_v14  ;;  %v94_v14 = vld [vmem:[%s3218_s3 + $0x38] sm:$0xff] }
 0xbb6   :  { %1333 = vrot.lane.b32.xlu1 %v2851_v49, %s2689_s19 }
 0xbba   :  { %1498 = vrot.lane.b32.xlu1 %v2851_v49, %s2686_s8 }
 0xbbe   :  { %1496 = vrot.lane.b32.xlu1 %v2851_v49, %s2688_s15 }
 0xbf6   :  { %v1161_v16 = vpop.xlane.xlu0 %1160 }
 0xbf7   :  { %2535 = vrcp.f32 %v1161_v16 }
 0xc01   :  { %v2536_v17 = vpop.eup %2535 }
 0xc02   :  { %v1163_v18 = vmul.f32 %v2536_v17, %v2534_v63 }
 0xc04   :  { %1926 = vst.msk [vmem:[#allocation9 + $0x20] sm:$0xff] %vm212_vm2, %v1163_v18 }
 0xc32   :  { %v1324_v19 = vpop.xlane.xlu1 %1323 }
 0xc33   :  { %v1325_v20 = vsub.f32 %v1321_v13, %v1324_v19  ;;  %v1933_v13 = vrot.slane %v2846_v43, %v137_v28 }
 0xc35   :  { %v1326_v21 = vmul.f32 1.442695, %v1325_v20  ;;  %v1934_v19 = vadd.f32 %v1933_v13, %v3030_v5 }
 0xc36   :  { %v1334_v29 = vpop.permute.xlu1 %1333 }
 0xc37   :  { %2537 = vpow2.f32 %v1326_v21  ;;  %v3112_v21 = vadd.f32 %v1934_v19, %v2801_v0 }
 0xc3a   :  { %v1499_v37 = vpop.permute.xlu1 %1498 }
 0xc41   :  { %v2538_v22 = vpop.eup %2537 }
 0xc42   :  { %v1328_v24 = vsel %vm212_vm2, %v2538_v22, 0.0 }
 0xc43   :  { %1329 = vadd.xlane.f32.xlu0 %v1328_v24 }
 0xc59   :  { %1164 = vrot.lane.b32.xlu0 %v2851_v49, %s2676_s27 }
 0xcd0   :  { %v1330_v25 = vpop.xlane.xlu0 %1329 }
 0xcd1   :  { %2539 = vrcp.f32 %v1330_v25 }
 0xcd4   :  { %v1165_v27 = vpop.permute.xlu0 %1164 }
 0xcd5   :  { %2394 = vmatpush3.msra.mxu0 %v1165_v27 }
 0xcd6   :  { %2396 = vmatmul.mubr.msk.f32.vlgmr.msra.gmra.mrb[24].mxu0 %vm212_vm2, %v1163_v18  ;;  %2403 = vmatprep.subr.mxu0 %v2682_v15 }
 0xcd7   :  { %2404 = vmatpush3.msra.mxu0 %v1334_v29  ;;  %2405 = vmatprep.mubr.msk.f32.mxu0 %vm2683_vm1, %v2682_v15 }
 0xcd8   :  { %2414 = vmatprep.subr.bf16.mxu0 %v2682_v15 }
 0xcdb   :  { %v2540_v52 = vpop.eup %2539 }
 0xcdc   :  { %v1332_v30 = vmul.f32 %v2540_v52, %v2538_v22 }
 0xcde   :  { %1927 = vst.msk [vmem:[#allocation9 + $0x28] sm:$0xff] %vm212_vm2, %v1332_v30  ;;  %2406 = vmatmul.mubr.msk.f32.vlgmr.msra.gmra.mrb[26].mxu0 %vm212_vm2, %v1332_v30 }
 0xcdf   :  { %2415 = vmatpush3.bf16.msra.mxu0 %v2941_v58  ;;  %2416 = vmatprep.mubr.msk.bf16.mxu0 %vm2683_vm1, %v2682_v15  ;;  %v1497_v58 = vpop.permute.xlu1 %1496 }
 0xce0   :  { %2425 = vmatprep.subr.mxu0 %v2682_v15 }
 0xda9   :  { %v1236_v46 = vpop.f32.mrb[24].mxu0 }
 0xdaa   :  { %v1240_v32 = vpack.c.bf16 %v1236_v46, %v1236_v46  ;;  %v2397_v33 = vpop.f32.mrb[25].mxu0 }
 0xdac   :  { %2417 = vmatmul.mubr.msk.bf16.vlgmr.msra.gmra.mrb[28].mxu0 %vm212_vm2, %v1240_v32 }
 0xdad   :  { %2427 = vmatprep.mubr.msk.f32.mxu0 %vm2683_vm1, %v2682_v15 }
 0xdb1   :  { %v1405_v34 = vpop.f32.mrb[26].mxu0 }
 0xdb2   :  { %v1409_v35 = vpack.c.bf16 %v1405_v34, %v1405_v34  ;;  %v2407_v36 = vpop.f32.mrb[27].mxu0 }
 0xdb4   :  { %2411 = vmatmul.mubr.msk.bf16.vlgmr.msra.gmra.mrb[16].mxu1 %vm212_vm2, %v1409_v35 }
 0xdb5   :  { %2421 = vmatpush3.xpose.msk.msra.mxu1 %vm212_vm2, %v1499_v37  ;;  %2422 = vmatprep.mubr.msk.f32.mxu1 %vm2683_vm1, %v2682_v15 }
 0xdb6   :  { %2430 = vmatprep.subr.bf16.mxu1 %v2682_v15 }
 0xdbc   :  { %2423 = vmatmul.mubr.msk.f32.vlgmr.msra.gmra.mrb[20].mxu1 %vm212_vm2, %v1497_v58 }
 0xdbd   :  { %2431 = vmatpush3.bf16.msra.mxu1 %v2966_v2  ;;  %2432 = vmatprep.mubr.msk.bf16.mxu1 %vm2683_vm1, %v2682_v15 }
 0xdbe   :  { %2446 = vmatprep.subr.bf16.mxu1 %v2682_v15 }
 0xe7f   :  { %v1490_v38 = vpop.f32.mrb[28].mxu0 }
 0xe80   :  { %v2418_v39 = vpop.f32.mrb[29].mxu0 }
 0xe81   :  { %v1493_v40 = vpop.f32.mrb[30].mxu0 }
 0xe82   :  { %v2419_v41 = vpop.f32.mrb[31].mxu0 }
 0xe87   :  { %v1447_v42 = vpop.f32.mrb[16].mxu1 }
 0xe88   :  { %v3072_v44 = vadd.f32 %v1490_v38, %v1447_v42  ;;  %v2412_v45 = vpop.f32.mrb[17].mxu1 }
 0xe89   :  { %v1450_v50 = vpop.f32.mrb[18].mxu1 }
 0xe8a   :  { %v2413_v51 = vpop.f32.mrb[19].mxu1 }
 0xe8f   :  { %v1570_v2 = vpop.f32.mrb[20].mxu1 }
 0xe90   :  { %v1574_v54 = vmul.f32 0.35355338, %v1570_v2  ;;  %v2424_v55 = vpop.f32.mrb[21].mxu1 }
 0xe92   :  { %v1575_v56 = vadd.f32 %v1574_v54, %v93_v53 }
 0xe94   :  { %v1576_v57 = vsel %vm1072_vm5, -1e+09, %v1575_v56 }
 0xe95   :  { %v1577_v59 = vsel %vm212_vm2, %v1576_v57, -inf }
 0xe96   :  { %1578 = vmax.xlane.f32.xlu0 %v1577_v59 }
 0xeac   :  { %1588 = vrot.lane.b32.xlu0 %v2851_v49, %s2692_s20 }
 0xeb0   :  { %1709 = vrot.lane.b32.xlu0 %v2851_v49, %s2691_s13 }
 0xf23   :  { %v1579_v60 = vpop.xlane.xlu0 %1578 }
 0xf24   :  { %v1580_v61 = vsub.f32 %v1576_v57, %v1579_v60 }
 0xf26   :  { %v1581_v62 = vmul.f32 1.442695, %v1580_v61  ;;  %v2503_v61 = vld [vmem:[#allocation7] sm:$0xff]  }
 0xf27   :  { %v1589_v63 = vpop.permute.xlu0 %1588 }
 0xf28   :  { %2541 = vpow2.f32 %v1581_v62  ;;  %2426 = vmatpush3.msra.mxu0 %v1589_v63 }
 0xf29   :  { %2436 = vmatprep.subr.mxu0 %v2682_v15 }
 0xf2b   :  { %v1710_v9 = vpop.permute.xlu0 %1709 }
 0xf32   :  { %v2542_v3 = vpop.eup %2541 }
 0xf33   :  { %v1583_v4 = vsel %vm212_vm2, %v2542_v3, 0.0 }
 0xf34   :  { %1584 = vadd.xlane.f32.xlu1 %v1583_v4 }
 0xf45   :  { %1711 = vrot.lane.b32.xlu1 %v2851_v49, %s2690_s0 }
 0xfc1   :  { %v1585_v6 = vpop.xlane.xlu1 %1584 }
 0xfc2   :  { %2543 = vrcp.f32 %v1585_v6 }
 0xfc5   :  { %v1712_v48 = vpop.permute.xlu1 %1711 }
 0xfcc   :  { %v2544_v7 = vpop.eup %2543 }
 0xfcd   :  { %v1587_v8 = vmul.f32 %v2544_v7, %v2542_v3 }
 0xfcf   :  { %1928 = vst.msk [vmem:[#allocation9 + $0x30] sm:$0xff] %vm212_vm2, %v1587_v8  ;;  %2428 = vmatmul.mubr.msk.f32.vlgmr.msra.gmra.mrb[32].mxu0 %vm212_vm2, %v1587_v8  ;;  %v1966_v8 = vsub.s32 2, %v2821_v23 }
 0xfd0   :  { %2437 = vmatpush3.xpose.msk.msra.mxu0 %vm212_vm2, %v1712_v48  ;;  %2438 = vmatprep.mubr.msk.f32.mxu0 %vm2683_vm1, %v2682_v15 }
 0xfd1   :  { %2441 = vmatprep.subr.mxu0 %v2682_v15 }
 0xfd3   :  { %2439 = vmatmul.mubr.msk.f32.vlgmr.msra.gmra.mrb[34].mxu0 %vm212_vm2, %v1710_v9  ;;  %v1967_v9 = vrot.slane %v2827_v26, %v1966_v8 }
 0xfd4   :  { %2443 = vmatprep.mubr.msk.f32.mxu0 %vm2683_vm1, %v2682_v15 }
0x10a2   :  { %v1660_v10 = vpop.f32.mrb[32].mxu0 }
0x10a3   :  { %v1664_v11 = vpack.c.bf16 %v1660_v10, %v1660_v10  ;;  %v2429_v12 = vpop.f32.mrb[33].mxu0 }
0x10a5   :  { %2433 = vmatmul.mubr.msk.bf16.vlgmr.msra.gmra.mrb[24].mxu1 %vm212_vm2, %v1664_v11  ;;  %v1972_v11 = vsub.s32 3, %v2821_v23 }
0x10a6   :  { %v1783_v16 = vpop.f32.mrb[34].mxu0  ;;  %2447 = vmatpush3.bf16.msra.mxu1 %v2993_v31  ;;  %2448 = vmatprep.mubr.msk.bf16.mxu1 %vm2683_vm1, %v2682_v15  ;;  %v1938_v31 = vsel %vm101_vm0, %v3112_v21, 0.0 }
0x10a7   :  { %v1787_v17 = vmul.f32 0.35355338, %v1783_v16  ;;  %v2440_v18 = vpop.f32.mrb[35].mxu0  ;;  %2460 = vmatprep.subr.bf16.mxu1 %v2682_v15  ;;  %v1973_v16 = vrot.slane %v2827_v26, %v1972_v11  ;;  %v2507_v26 = vld [vmem:[%s3222_s7 + $0x10] sm:$0xff]  }
0x10a9   :  { %v1788_v20 = vadd.f32 %v1787_v17, %v94_v14 }
0x10ab   :  { %v1789_v28 = vsel %vm1072_vm5, -1e+09, %v1788_v20 }
0x10ac   :  { %v1790_v22 = vsel %vm212_vm2, %v1789_v28, -inf }
0x10ad   :  { %1791 = vmax.xlane.f32.xlu1 %v1790_v22  ;;  %v2506_v22 = vld [vmem:[%s3222_s7 + $0x8] sm:$0xff]  }
0x10b1   :  { %1939 = vadd.xlane.f32.xlu1 %v1938_v31  ;;  %v2508_v31 = vld [vmem:[%s3222_s7 + $0x18] sm:$0xff]  }
0x113a   :  { %v1792_v24 = vpop.xlane.xlu1 %1791 }
0x113b   :  { %v1793_v25 = vsub.f32 %v1789_v28, %v1792_v24  ;;  %v2505_v28 = vld [vmem:[%s3222_s7] sm:$0xff]  }
0x113c   :  { %v2509_v24 = vld [vmem:[%s3222_s7 + $0x20] sm:$0xff]  }
0x113d   :  { %v1794_v27 = vmul.f32 1.442695, %v1793_v25  ;;  %v2510_v25 = vld [vmem:[%s3222_s7 + $0x28] sm:$0xff]  }
0x113e   :  { %v1940_v58 = vpop.xlane.xlu1 %1939 }
0x113f   :  { %2545 = vpow2.f32 %v1794_v27  ;;  %v1944_v38 = vmul.f32 0.03125, %v1940_v58  ;;  %v2511_v27 = vld [vmem:[%s3222_s7 + $0x30] sm:$0xff]  }
0x1149   :  { %v2546_v29 = vpop.eup %2545 }
0x114a   :  { %v1796_v5 = vsel %vm212_vm2, %v2546_v29, 0.0 }
0x114b   :  { %1797 = vadd.xlane.f32.xlu0 %v1796_v5  ;;  %v1984_v5 = vrot.slane %v2846_v43, %v1966_v8 }
0x1161   :  { %1801 = vrot.lane.b32.xlu0 %v2851_v49, %s2693_s12 }
0x1178   :  { %v1702_v0 = vpop.f32.mrb[24].mxu1 }
0x1179   :  { %v1708_v47 = vadd.f32 %v1702_v0, %v3072_v44  ;;  %v2434_v52 = vpop.f32.mrb[25].mxu1  ;;  %v1946_v44 = vsub.f32 %v3112_v21, %v1944_v38 }
0x117a   :  { %v1705_v30 = vpop.f32.mrb[26].mxu1 }
0x117b   :  { %v2435_v46 = vpop.f32.mrb[27].mxu1  ;;  %v1948_v2 = vmul.f32 %v1946_v44, %v1946_v44 }
0x117d   :  { %v1950_v54 = vsel %vm101_vm0, %v1948_v2, 0.0 }
0x11d8   :  { %v1798_v32 = vpop.xlane.xlu0 %1797 }
0x11d9   :  { %2547 = vrcp.f32 %v1798_v32 }
0x11dc   :  { %v1802_v33 = vpop.permute.xlu0 %1801 }
0x11dd   :  { %2442 = vmatpush3.msra.mxu0 %v1802_v33 }
0x11de   :  { %2452 = vmatprep.subr.bf16.mxu0 %v2682_v15 }
0x11e3   :  { %v2548_v34 = vpop.eup %2547 }
0x11e4   :  { %v1800_v35 = vmul.f32 %v2548_v34, %v2546_v29  ;;  %v2512_v29 = vld [vmem:[%s3222_s7 + $0x38] sm:$0xff]   ;;  %s2694_s7 = smov [#allocation9]  }
0x11e5   :  { %s2190_s5 = sshll.u32 %s2694_s7, 4  ;;  %s2191_s5 = int_to_ptr.vmem [resolvable:$true] %s2190_s5 }
0x11e6   :  { %1929 = vst.msk [vmem:[#allocation9 + $0x38] sm:$0xff] %vm212_vm2, %v1800_v35  ;;  %2444 = vmatmul.mubr.msk.f32.vlgmr.msra.gmra.mrb[36].mxu0 %vm212_vm2, %v1800_v35  ;;  %s2623_s1 = scalar_lea.vmem %s2191_s5, 1024  ;;  %p2628_p11 = scmp.lt.s32.totalorder %s2191_s5, %s2191_s5 }
0x11e7   :  { %2456 = vmatprep.mubr.msk.bf16.mxu0 %vm2683_vm1, %v2682_v15  ;;  %2453 = vmatpush3.bf16.msra.mxu0 %v2503_v61  ;;  %p2624_p10 = scmp.ne.s32.totalorder %s2191_s5, %s2623_s1  ;;  %p2629_p12 = scmp.lt.s32.totalorder %s2623_s1, %s2623_s1 }
0x11e8   :  { %2454 = vmatprep.subr.bf16.mxu0 %v2682_v15 }
0x11e9   :  { %p2630_p13 = por %p2629_p12, %p2628_p11 }
0x11eb   :  { %p2631_p0 = pnand %p2630_p13, %p2624_p10 }
0x12b9   :  { %v1873_v49 = vpop.f32.mrb[36].mxu0 }
0x12ba   :  { %v1877_v36 = vpack.c.bf16 %v1873_v49, %v1873_v49  ;;  %v2445_v37 = vpop.f32.mrb[37].mxu0 }
0x12bc   :  { %2449 = vmatmul.mubr.msk.bf16.vlgmr.msra.gmra.mrb[28].mxu1 %vm212_vm2, %v1877_v36 }
0x12bd   :  { %2476 = vmatprep.mubr.msk.bf16.mxu1 %vm2683_vm1, %v2682_v15  ;;  %2461 = vmatpush3.bf16.msra.mxu1 %v2505_v28 }
0x12be   :  { %2462 = vmatprep.subr.bf16.mxu1 %v2682_v15 }
0x12c1   :  { %2463 = vmatpush3.bf16.msra.mxu1 %v2506_v22 }
0x12c2   :  { %2464 = vmatprep.subr.bf16.mxu1 %v2682_v15 }
0x12c5   :  { %2465 = vmatpush3.bf16.msra.mxu1 %v2507_v26 }
0x12c6   :  { %2466 = vmatprep.subr.bf16.mxu1 %v2682_v15 }
0x12c9   :  { %2467 = vmatpush3.bf16.msra.mxu1 %v2508_v31 }
0x12ca   :  { %2468 = vmatprep.subr.bf16.mxu1 %v2682_v15 }
0x12cd   :  { %2469 = vmatpush3.bf16.msra.mxu1 %v2509_v24 }
0x12ce   :  { %2470 = vmatprep.subr.bf16.mxu1 %v2682_v15 }
0x12d1   :  { %2471 = vmatpush3.bf16.msra.mxu1 %v2510_v25 }
0x12d2   :  { %2472 = vmatprep.subr.bf16.mxu1 %v2682_v15 }
0x12d5   :  { %2473 = vmatpush3.bf16.msra.mxu1 %v2511_v27 }
0x12d6   :  { %2474 = vmatprep.subr.bf16.mxu1 %v2682_v15 }
0x12d9   :  { %2475 = vmatpush3.bf16.msra.mxu1 %v2512_v29 }
0x138f   :  { %v1915_v39 = vpop.f32.mrb[28].mxu1 }
0x1390   :  { %v1921_v40 = vadd.f32 %v1915_v39, %v1708_v47  ;;  %v2450_v41 = vpop.f32.mrb[29].mxu1 }
0x1391   :  { %v1918_v42 = vpop.f32.mrb[30].mxu1 }
0x1392   :  { %v1935_v45 = vadd.f32 %v1933_v13, %v1921_v40  ;;  %v2451_v50 = vpop.f32.mrb[31].mxu1 }
0x1394   :  { %v3131_v51 = vadd.f32 %v1935_v45, %v2803_v1  ;;  %v2504_v1 = vld [vmem:[#allocation7 + $0x8] sm:$0xff]  }
0x1395   :  { %2455 = vmatpush3.bf16.msra.mxu0 %v2504_v1 }
0x1396   :  { %v1941_v53 = vsel %vm101_vm0, %v3131_v51, 0.0 }
0x1397   :  { %1942 = vadd.xlane.f32.xlu1 %v1941_v53 }
0x139b   :  { %1951 = vadd.xlane.f32.xlu1 %v1950_v54 }
0x1424   :  { %v1943_v55 = vpop.xlane.xlu1 %1942 }
0x1425   :  { %v1945_v56 = vmul.f32 0.03125, %v1943_v55 }
0x1427   :  { %v1947_v57 = vsub.f32 %v3131_v51, %v1945_v56 }
0x1428   :  { %v1952_v62 = vpop.xlane.xlu1 %1951 }
0x1429   :  { %v1949_v59 = vmul.f32 %v1947_v57, %v1947_v57  ;;  %v1956_v63 = vmul.f32 0.03125, %v1952_v62 }
0x142b   :  { %v1953_v60 = vsel %vm101_vm0, %v1949_v59, 0.0  ;;  %v1958_v3 = vadd.f32 1e-06, %v1956_v63 }
0x142c   :  { %1954 = vadd.xlane.f32.xlu1 %v1953_v60 }
0x142d   :  { %2549 = vrsqrt.f32 %v1958_v3 }
0x1437   :  { %v2550_v48 = vpop.eup %2549 }
0x1438   :  { %v1962_v10 = vmul.f32 %v2550_v48, %v1946_v44 }
0x143a   :  { %v1968_v13 = vmul.f32 %v1967_v9, %v1962_v10 }
0x143c   :  { %v1974_v18 = vadd.f32 %v1973_v16, %v1968_v13 }
0x14b9   :  { %v1955_v4 = vpop.xlane.xlu1 %1954 }
0x14ba   :  { %v1957_v6 = vmul.f32 0.03125, %v1955_v4 }
0x14bc   :  { %v1959_v7 = vadd.f32 1e-06, %v1957_v6 }
0x14be   :  { %2551 = vrsqrt.f32 %v1959_v7 }
0x14c8   :  { %v2552_v12 = vpop.eup %2551 }
0x14c9   :  { %v1963_v14 = vmul.f32 %v2552_v12, %v1947_v57 }
0x14cb   :  { %v1969_v17 = vmul.f32 %v1967_v9, %v1963_v14 }
0x14cd   :  { %v1975_v19 = vadd.f32 %v1973_v16, %v1969_v17 }
0x14cf   :  { %v1976_v20 = vpack.c.bf16 %v1975_v19, %v1974_v18 }
0x14d1   :  { %2457 = vmatmul.mubr.msk.bf16.vlgmr.msra.gmra.mrb[40].mxu0 %vm101_vm0, %v1976_v20 }
0x15a4   :  { %v2034_v0 = vpop.f32.mrb[40].mxu0 }
0x15a5   :  { %v2035_v47 = vadd.f32 %v2034_v0, %v1984_v5  ;;  %v2458_v52 = vpop.f32.mrb[41].mxu0 }
0x15a6   :  { %v2037_v30 = vpop.f32.mrb[42].mxu0 }
0x15a7   :  { %v2041_v46 = vmul.f32 %v2035_v47, %v2035_v47  ;;  %v2038_v32 = vadd.f32 %v2037_v30, %v1984_v5  ;;  %v2459_v33 = vpop.f32.mrb[43].mxu0 }
0x15a9   :  { %v2043_v34 = vmul.f32 %v2041_v46, %v2035_v47  ;;  %v2042_v35 = vmul.f32 %v2038_v32, %v2038_v32 }
0x15ab   :  { %v2045_v49 = vmul.f32 0.044715, %v2043_v34  ;;  %v2044_v36 = vmul.f32 %v2042_v35, %v2038_v32 }
0x15ad   :  { %v2047_v37 = vadd.f32 %v2045_v49, %v2035_v47  ;;  %v2046_v15 = vmul.f32 0.044715, %v2044_v36 }
0x15af   :  { %v2049_v58 = vmul.f32 0.7978846, %v2047_v37  ;;  %v2048_v38 = vadd.f32 %v2046_v15, %v2038_v32 }
0x15b1   :  { %2553 = vtanh.f32 %v2049_v58  ;;  %v2050_v39 = vmul.f32 0.7978846, %v2048_v38 }
0x15b3   :  { %2555 = vtanh.f32 %v2050_v39 }
0x15bb   :  { %v2554_v40 = vpop.eup %2553 }
0x15bc   :  { %v2053_v41 = vadd.f32 1.0, %v2554_v40 }
0x15bd   :  { %v2556_v42 = vpop.eup %2555 }
0x15be   :  { %v2055_v44 = vmul.f32 0.5, %v2053_v41  ;;  %v2054_v45 = vadd.f32 1.0, %v2556_v42 }
0x15c0   :  { %v2056_v50 = vmul.f32 0.5, %v2054_v45  ;;  %v2057_v53 = vmul.f32 %v2055_v44, %v2035_v47 }
0x15c2   :  { %v2058_v2 = vmul.f32 %v2056_v50, %v2038_v32 }
0x15c4   :  { %v2059_v54 = vpack.c.bf16 %v2058_v2, %v2057_v53 }
0x15c6   :  { %2477 = vmatmul.mubr.bf16.vlgmr.msra.gmra.mrb[32].mxu1 %v2059_v54 }
0x15c7   :  { %2634 = shalt.err (!%p2631_p0)
}
0x15c8   :  { %s2635_s2 = scalar_lea.hbm %s3226_s11, 1024 }
0x15c9   :  { %p2636_p1 = scmp.ne.s32.totalorder %s3226_s11, %s2635_s2  ;;  %p2639_p2 = scmp.lt.u32.totalorder %s2635_s2, %s3226_s11 }
0x15cb   :  { %p2641_p3 = pnand %p2639_p2, %p2636_p1 }
0x15cd   :  { %2644 = shalt.err (!%p2641_p3)
}
0x15ce   :  { %2196 = dma.vmem_to_hbm [thread:$0]  %s2191_s5, 1024, %s3226_s11, [#allocation10], %s2679_s4, %s2679_s4, %s2680_s18   ;;  %v2079_v55 = vrot.slane %v2846_v43, %v1972_v11 }
0x15cf   :  { %s2695_s0 = smov [#allocation8]  }
0x15d0   :  { %s2178_s13 = sshll.u32 %s2695_s0, 4  ;;  %s2179_s13 = int_to_ptr.vmem [resolvable:$true] %s2178_s13 }
0x15d1   :  { %s2645_s11 = scalar_lea.vmem %s2179_s13, 256  ;;  %p2650_p5 = scmp.lt.s32.totalorder %s2179_s13, %s2179_s13 }
0x15d2   :  { %p2646_p4 = scmp.ne.s32.totalorder %s2179_s13, %s2645_s11  ;;  %p2651_p6 = scmp.lt.s32.totalorder %s2645_s11, %s2645_s11 }
0x15d4   :  { %p2652_p7 = por %p2651_p6, %p2650_p5 }
0x15d6   :  { %p2653_p8 = pnand %p2652_p7, %p2646_p4 }
0x1699   :  { %v2162_v56 = vpop.f32.mrb[32].mxu1 }
0x169a   :  { %v2163_v57 = vadd.f32 %v2162_v56, %v2079_v55  ;;  %v2478_v59 = vpop.f32.mrb[33].mxu1 }
0x169b   :  { %v2165_v60 = vpop.f32.mrb[34].mxu1 }
0x169c   :  { %v2169_v61 = vadd.f32 %v2163_v57, %v3112_v21  ;;  %v2166_v1 = vadd.f32 %v2165_v60, %v2079_v55  ;;  %v2479_v62 = vpop.f32.mrb[35].mxu1 }
0x169e   :  { %2171 = vst.msk [vmem:[#allocation8] sm:$0xff] %vm101_vm0, %v2169_v61  ;;  %v2170_v63 = vadd.f32 %v2166_v1, %v3131_v51 }
0x16a0   :  { %2172 = vst.msk [vmem:[#allocation8 + $0x8] sm:$0xff] %vm101_vm0, %v2170_v63 }
0x16a1   :  { %2656 = shalt.err (!%p2653_p8)
}
0x16a2   :  { %s2657_s21 = scalar_lea.hbm %s3225_s10, 256 }
0x16a3   :  { %p2658_p9 = scmp.ne.s32.totalorder %s3225_s10, %s2657_s21  ;;  %p2661_p10 = scmp.lt.u32.totalorder %s2657_s21, %s3225_s10 }
0x16a5   :  { %p2663_p11 = pnand %p2661_p10, %p2658_p9 }
0x16a7   :  { %2666 = shalt.err (!%p2663_p11)
}
0x16a8   :  { %2184 = dma.vmem_to_hbm [thread:$0]  %s2179_s13, 256, %s3225_s10, [#allocation4], %s2679_s4, %s2679_s4, %s2680_s18  }
0x16a9   :  { %2671 = dma.done.wait [#allocation4], 256  }
0x16aa   :  { %2672 = vsyncadd [#allocation4], 4294967040 }
0x16ab   :  { %2673 = dma.done.wait [#allocation10], 1024  }
0x16ac   :  { %2674 = vsyncadd [#allocation10], 4294966272 }
0x16ad   :  { %2203 = vsyncpa [#allocation3], 1 }
0x16ae   :  { %2204 = vsyncpa [#allocation6], 1 }
0x16af   :  { %2205 = vsyncpa [#allocation4], 1 }
0x16b0   :  { %2206 = vsyncpa [#allocation10], 1 }

</bundles_post_ra>
